<compile_context>
chip_gen: v6e
topology: v6e:2x2x1
jax: 0.10.0
libtpu: 0.0.40
codegen_flags: <defaults>
</compile_context>

<pallas_src>
import jax
import jax.numpy as jnp
from jax import lax
from jax.experimental import pallas as pl
from jax.experimental.pallas import tpu as pltpu


def _round_up(x: int, m: int) -> int:
    return (x + m - 1) // m * m


def _gru_fc_kernel(x_ref, wih_ref, whh_ref, bi_ref, bhn_ref, fcw_ref, fcb_ref,
                   out_ref, gi_ref, act_ref):
    """One grid step == one GRU layer (grid=(L,), "arbitrary").

    Kernel-view shapes:
      x_ref   : (T*Bp, Hp)  bf16  embedded input (resident across layers)
      wih_ref : (Hp, 3Hp)   bf16  this layer's input-projection weights
      whh_ref : (Hp, 3Hp)   bf16  this layer's recurrent weights
      bi_ref  : (1, 3Hp)    f32   fused biases [b_ih+b_hh | b_ih+b_hh | b_ih]
      bhn_ref : (1, Hp)     f32   b_hh for the n gate only
      fcw_ref : (Hp, Cp)    bf16  final linear weight
      fcb_ref : (1, Cp)     f32
      out_ref : (Bp, Cp)    f32   written only on the last layer
      gi_ref  : (T*Bp, 3Hp) f32   scratch: hoisted input projections
      act_ref : (T*Bp, Hp)  bf16  scratch: inter-layer activations (persists)
    """
    l = pl.program_id(0)
    Bp = out_ref.shape[0]
    Hp = whh_ref.shape[0]
    T = gi_ref.shape[0] // Bp

    # Layer 0 consumes the embedded input; later layers consume the previous
    # layer's activations already sitting in act_ref (persistent scratch).
    @pl.when(l == 0)
    def _():
        act_ref[...] = x_ref[...]

    # Hoisted input projection for ALL timesteps: one big MXU matmul.
    # (bias folded lazily into the per-step gate math, not into the slab)
    gi_ref[...] = jnp.dot(act_ref[...], wih_ref[...],
                          preferred_element_type=jnp.float32)

    whh = whh_ref[...]          # (Hp, 3Hp) bf16
    bi = bi_ref[...]            # (1, 3Hp)  broadcasts against (Bp, 3Hp)
    bhn_n = bhn_ref[...]        # (1, Hp)

    # TODO(synk): make this weight-stationary via pltpu.matmul_push_rhs /
    # matmul_acc_lhs / matmul_pop to avoid re-loading whh into the MXU per step.
    def step(t, h):
        row = pl.multiple_of(t * Bp, 8)          # sublane-aligned dynamic slice
        rows = pl.ds(row, Bp)
        gh = jnp.dot(h.astype(jnp.bfloat16), whh,
                     preferred_element_type=jnp.float32)
        gi_t = gi_ref[rows, :] + bi              # (Bp, 3Hp)
        r = jax.nn.sigmoid(gi_t[:, :Hp] + gh[:, :Hp])
        z = jax.nn.sigmoid(gi_t[:, Hp:2 * Hp] + gh[:, Hp:2 * Hp])
        n = jnp.tanh(gi_t[:, 2 * Hp:] + r * (gh[:, 2 * Hp:] + bhn_n))
        h_new = n + z * (h - n)                  # == (1-z)*n + z*h
        act_ref[rows, :] = h_new.astype(jnp.bfloat16)   # next layer's input
        return h_new

    h0 = jnp.zeros((Bp, Hp), jnp.float32)
    h = lax.fori_loop(0, T, step, h0, unroll=True)

    # Final FC on the last layer's last hidden state (lane-dense Cp output).
    @pl.when(l == pl.num_programs(0) - 1)
    def _():
        out_ref[...] = (jnp.dot(h.astype(jnp.bfloat16), fcw_ref[...],
                                preferred_element_type=jnp.float32)
                        + fcb_ref[...])


def init_params(key, input_dim, hidden_dim, num_layers, num_classes):
    """Raw parameters in PyTorch layouts (nn.Embedding / nn.GRU / nn.Linear)."""
    H = hidden_dim * 2          # GRU hidden size
    D = hidden_dim              # embedding dim == GRU input size
    k_emb, k = jax.random.split(key)
    params = {"embedding": jax.random.normal(k_emb, (input_dim, D), jnp.float32)}

    scale = 1.0 / (H ** 0.5)
    layers = []
    for l in range(num_layers):
        in_dim = D if l == 0 else H
        k, k1, k2, k3, k4 = jax.random.split(k, 5)
        layers.append({
            "w_ih": jax.random.uniform(k1, (3 * H, in_dim), jnp.float32, -scale, scale),
            "w_hh": jax.random.uniform(k2, (3 * H, H), jnp.float32, -scale, scale),
            "b_ih": jax.random.uniform(k3, (3 * H,), jnp.float32, -scale, scale),
            "b_hh": jax.random.uniform(k4, (3 * H,), jnp.float32, -scale, scale),
        })
    params["layers"] = layers

    k, k5, k6 = jax.random.split(k, 3)
    params["fc_w"] = jax.random.uniform(k5, (num_classes, H), jnp.float32, -scale, scale)
    params["fc_b"] = jax.random.uniform(k6, (num_classes,), jnp.float32, -scale, scale)
    return params


def pack_params(params, hp, cp):
    """Build gate-aligned, zero-padded, bf16 kernel operands."""
    layers = params["layers"]
    H = layers[0]["w_hh"].shape[1]
    Hp, Cp = hp, cp

    def pad_gate_w(w_gate):                       # (H, in_dim) torch layout
        wt = w_gate.T                             # (in_dim, H)
        return jnp.pad(wt, ((0, Hp - wt.shape[0]), (0, Hp - H)))

    def pad_b(b):
        return jnp.pad(b, (0, Hp - H))

    wih_l, whh_l, bi_l, bhn_l = [], [], [], []
    for lp in layers:
        w_ih, w_hh, b_ih, b_hh = lp["w_ih"], lp["w_hh"], lp["b_ih"], lp["b_hh"]
        wih_l.append(jnp.concatenate(
            [pad_gate_w(w_ih[g * H:(g + 1) * H]) for g in range(3)], axis=1))
        whh_l.append(jnp.concatenate(
            [pad_gate_w(w_hh[g * H:(g + 1) * H]) for g in range(3)], axis=1))
        bi_l.append(jnp.concatenate(
            [pad_b(b_ih[0:H] + b_hh[0:H]),                   # r: fused
             pad_b(b_ih[H:2 * H] + b_hh[H:2 * H]),           # z: fused
             pad_b(b_ih[2 * H:3 * H])]).reshape(1, 3 * Hp))  # n: input bias only
        bhn_l.append(pad_b(b_hh[2 * H:3 * H]).reshape(1, Hp))  # n: hidden bias

    C = params["fc_w"].shape[0]
    packed = {
        "W_ih": jnp.stack(wih_l).astype(jnp.bfloat16),     # (L, Hp, 3Hp)
        "W_hh": jnp.stack(whh_l).astype(jnp.bfloat16),     # (L, Hp, 3Hp)
        "B_i": jnp.stack(bi_l),                            # (L, 1, 3Hp) f32
        "B_hn": jnp.stack(bhn_l),                          # (L, 1, Hp)  f32
        "FC_w": jnp.pad(params["fc_w"].T,
                        ((0, Hp - H), (0, Cp - C))).astype(jnp.bfloat16),  # (Hp, Cp)
        "FC_b": jnp.pad(params["fc_b"], (0, Cp - C)).reshape(1, Cp),       # (1, Cp)
        "Emb": jnp.pad(params["embedding"],
                       ((0, 0), (0, Hp - params["embedding"].shape[1]))),  # (V, Hp)
    }
    return packed


def gru2_forward(x_ids, packed, *, num_classes):
    """Pallas-backed forward equivalent to GRU_2.forward (inference)."""
    B, T = x_ids.shape
    L, Hp = packed["W_hh"].shape[0], packed["W_hh"].shape[1]
    Cp = packed["FC_w"].shape[1]
    Bp = _round_up(max(B, 8), 8)                  # pad batch to sublane multiple

    # Embedding gather (plain-JAX glue), batch pad, time-major flatten, bf16 feed.
    x_emb = packed["Emb"][x_ids]                  # (B, T, Hp) f32
    x_emb = jnp.pad(x_emb, ((0, Bp - B), (0, 0), (0, 0)))
    x_flat = (jnp.transpose(x_emb, (1, 0, 2))
              .reshape(T * Bp, Hp).astype(jnp.bfloat16))

    # VMEM budget sized per chip generation from the actual footprint
    # (per-layer weights are double-buffered by the layer grid axis).
    footprint = (2 * 2 * (Hp * 3 * Hp * 2)            # W_ih + W_hh, 2-buffered, bf16
                 + 2 * ((3 * Hp + Hp) * 4)            # biases, 2-buffered, f32
                 + T * Bp * Hp * 2                    # x (bf16, resident)
                 + T * Bp * 3 * Hp * 4                # gi scratch (f32)
                 + T * Bp * Hp * 2                    # act scratch (bf16)
                 + Hp * Cp * 2 + Cp * 4 + Bp * Cp * 4)
    try:
        vmem_cap = int(getattr(pltpu.get_tpu_info(), "vmem_capacity_bytes",
                               64 * 1024 * 1024))
    except Exception:
        vmem_cap = 64 * 1024 * 1024
    vmem_limit = int(min(0.75 * vmem_cap, max(4 * footprint, 16 * 1024 * 1024)))

    out = pl.pallas_call(
        _gru_fc_kernel,
        out_shape=jax.ShapeDtypeStruct((Bp, Cp), jnp.float32),
        grid_spec=pltpu.PrefetchScalarGridSpec(
            num_scalar_prefetch=0,
            grid=(L,),
            in_specs=[
                pl.BlockSpec((T * Bp, Hp), lambda l: (0, 0)),          # x (resident)
                pl.BlockSpec((None, Hp, 3 * Hp), lambda l: (l, 0, 0)),  # W_ih[l]
                pl.BlockSpec((None, Hp, 3 * Hp), lambda l: (l, 0, 0)),  # W_hh[l]
                pl.BlockSpec((None, 1, 3 * Hp), lambda l: (l, 0, 0)),   # B_i[l]
                pl.BlockSpec((None, 1, Hp), lambda l: (l, 0, 0)),       # B_hn[l]
                pl.BlockSpec((Hp, Cp), lambda l: (0, 0)),               # FC_w
                pl.BlockSpec((1, Cp), lambda l: (0, 0)),                # FC_b
            ],
            out_specs=pl.BlockSpec((Bp, Cp), lambda l: (0, 0)),
            scratch_shapes=[
                pltpu.VMEM((T * Bp, 3 * Hp), jnp.float32),   # hoisted projections
                pltpu.VMEM((T * Bp, Hp), jnp.bfloat16),      # inter-layer activations
            ],
        ),
        compiler_params=pltpu.CompilerParams(
            dimension_semantics=("arbitrary",),
            vmem_limit_bytes=vmem_limit,
        ),
    )(x_flat, packed["W_ih"], packed["W_hh"], packed["B_i"], packed["B_hn"],
      packed["FC_w"], packed["FC_b"])

    return out[:B, :num_classes]


def reference_forward(x_ids, params):
    """Pure-JAX f32 reference matching PyTorch GRU_2 inference semantics."""
    x = params["embedding"][x_ids]                # (B, T, D)
    B, T, _ = x.shape
    H = params["layers"][0]["w_hh"].shape[1]
    inp = x
    for lp in params["layers"]:
        wih_t, whh_t = lp["w_ih"].T, lp["w_hh"].T
        h = jnp.zeros((B, H), jnp.float32)
        outs = []
        for t in range(T):
            gi = inp[:, t, :] @ wih_t + lp["b_ih"]
            gh = h @ whh_t + lp["b_hh"]
            r = jax.nn.sigmoid(gi[:, :H] + gh[:, :H])
            z = jax.nn.sigmoid(gi[:, H:2 * H] + gh[:, H:2 * H])
            n = jnp.tanh(gi[:, 2 * H:] + r * gh[:, 2 * H:])
            h = (1.0 - z) * n + z * h
            outs.append(h)
        inp = jnp.stack(outs, axis=1)
    return inp[:, -1, :] @ params["fc_w"].T + params["fc_b"]


if __name__ == "__main__":
    # GRU_2(input_dim=16, hidden_dim=32, num_layers=2, num_classes=8, dropout=0.25)
    input_dim, hidden_dim, num_layers, num_classes = 16, 32, 2, 8
    B, T = 2, 8

    key = jax.random.PRNGKey(0)
    k_x, k_p = jax.random.split(key)
    x_ids = jax.random.randint(k_x, (B, T), 0, input_dim, dtype=jnp.int32)
    params = init_params(k_p, input_dim, hidden_dim, num_layers, num_classes)

    H = hidden_dim * 2
    Hp = _round_up(H, 128)
    Cp = _round_up(num_classes, 128)
    packed = pack_params(params, Hp, Cp)

    out = gru2_forward(x_ids, packed, num_classes=num_classes)
    out = jax.block_until_ready(out)

    ref = reference_forward(x_ids, params)
    assert out.shape == (B, num_classes)
    # bf16 weights + bf16 inter-layer activations (f32 accumulate) -> loose tol.
    assert jnp.allclose(out, ref, atol=2e-2, rtol=2e-2), (out, ref)
    print("KERNEL_OK")
</pallas_src>

<mosaic_0001>
module attributes {stable_mosaic.version = 11 : i64} {
  func.func @_gru_fc_kernel(%arg0: i32, %arg1: memref<64x128xbf16, #tpu.memory_space<vmem>>, %arg2: memref<1x128x384xbf16, #tpu.memory_space<vmem>>, %arg3: memref<1x128x384xbf16, #tpu.memory_space<vmem>>, %arg4: memref<1x1x384xf32, #tpu.memory_space<vmem>>, %arg5: memref<1x1x128xf32, #tpu.memory_space<vmem>>, %arg6: memref<128x128xbf16, #tpu.memory_space<vmem>>, %arg7: memref<1x128xf32, #tpu.memory_space<vmem>>, %arg8: memref<8x128xf32, #tpu.memory_space<vmem>>, %arg9: memref<64x384xf32, #tpu.memory_space<vmem>>, %arg10: memref<64x128xbf16, #tpu.memory_space<vmem>>) attributes {dimension_semantics = [#tpu.dimension_semantics<arbitrary>], iteration_bounds = array<i64: 2>, scalar_prefetch = 0 : i64, scratch_operands = 2 : i64, tpu.core_type = #tpu.core_type<tc>, window_params = [{pipeline_mode = #tpu.pipeline_mode<synchronous>, transform_indices = @transform_0, window_bounds = array<i64: 64, 128>}, {transform_indices = @transform_1, window_bounds = array<i64: 1, 128, 384>}, {transform_indices = @transform_2, window_bounds = array<i64: 1, 128, 384>}, {transform_indices = @transform_3, window_bounds = array<i64: 1, 1, 384>}, {transform_indices = @transform_4, window_bounds = array<i64: 1, 1, 128>}, {pipeline_mode = #tpu.pipeline_mode<synchronous>, transform_indices = @transform_5, window_bounds = array<i64: 128, 128>}, {pipeline_mode = #tpu.pipeline_mode<synchronous>, transform_indices = @transform_6, window_bounds = array<i64: 1, 128>}, {pipeline_mode = #tpu.pipeline_mode<synchronous>, transform_indices = @transform_7, window_bounds = array<i64: 8, 128>}]} {
    %c0_i32 = arith.constant 0 : i32
    %0 = arith.cmpi eq, %arg0, %c0_i32 : i32
    %1 = arith.extui %0 : i1 to i32
    %c0_i32_0 = arith.constant 0 : i32
    %2 = arith.cmpi ne, %1, %c0_i32_0 : i32
    scf.if %2 {
      %c0_68 = arith.constant 0 : index
      %c0_69 = arith.constant 0 : index
      %314 = vector.load %arg1[%c0_68, %c0_69] : memref<64x128xbf16, #tpu.memory_space<vmem>>, vector<64x128xbf16>
      %c0_70 = arith.constant 0 : index
      %c0_71 = arith.constant 0 : index
      %315 = vector.load %arg10[%c0_70, %c0_71] : memref<64x128xbf16, #tpu.memory_space<vmem>>, vector<64x128xbf16>
      tpu.vector_store %arg10[%c0_70, %c0_71], %314 {strides = array<i32>} : memref<64x128xbf16, #tpu.memory_space<vmem>>, vector<64x128xbf16>,
    } else {
    }
    %c0 = arith.constant 0 : index
    %c0_1 = arith.constant 0 : index
    %3 = vector.load %arg10[%c0, %c0_1] : memref<64x128xbf16, #tpu.memory_space<vmem>>, vector<64x128xbf16>
    %c0_2 = arith.constant 0 : index
    %c0_3 = arith.constant 0 : index
    %c0_4 = arith.constant 0 : index
    %4 = vector.load %arg2[%c0_2, %c0_3, %c0_4] : memref<1x128x384xbf16, #tpu.memory_space<vmem>>, vector<1x128x384xbf16>
    %5 = vector.shape_cast %4 : vector<1x128x384xbf16> to vector<128x384xbf16>
    %cst = arith.constant dense<0.000000e+00> : vector<64x384xf32>
    %6 = tpu.matmul %3, %5, %cst {dimension_numbers = #tpu.dot_dimension_numbers<[1], [0], [0], [1], [0, 0, 1, 1], [], []>} : vector<64x128xbf16>, vector<128x384xbf16>, vector<64x384xf32> -> vector<64x384xf32>
    %c0_5 = arith.constant 0 : index
    %c0_6 = arith.constant 0 : index
    %7 = vector.load %arg9[%c0_5, %c0_6] : memref<64x384xf32, #tpu.memory_space<vmem>>, vector<64x384xf32>
    tpu.vector_store %arg9[%c0_5, %c0_6], %6 {strides = array<i32>} : memref<64x384xf32, #tpu.memory_space<vmem>>, vector<64x384xf32>,
    %c0_7 = arith.constant 0 : index
    %c0_8 = arith.constant 0 : index
    %c0_9 = arith.constant 0 : index
    %8 = vector.load %arg3[%c0_7, %c0_8, %c0_9] : memref<1x128x384xbf16, #tpu.memory_space<vmem>>, vector<1x128x384xbf16>
    %9 = vector.shape_cast %8 : vector<1x128x384xbf16> to vector<128x384xbf16>
    %c0_10 = arith.constant 0 : index
    %c0_11 = arith.constant 0 : index
    %c0_12 = arith.constant 0 : index
    %10 = vector.load %arg4[%c0_10, %c0_11, %c0_12] : memref<1x1x384xf32, #tpu.memory_space<vmem>>, vector<1x1x384xf32>
    %11 = vector.shape_cast %10 : vector<1x1x384xf32> to vector<1x384xf32>
    %c0_13 = arith.constant 0 : index
    %c0_14 = arith.constant 0 : index
    %c0_15 = arith.constant 0 : index
    %12 = vector.load %arg5[%c0_13, %c0_14, %c0_15] : memref<1x1x128xf32, #tpu.memory_space<vmem>>, vector<1x1x128xf32>
    %13 = vector.shape_cast %12 : vector<1x1x128xf32> to vector<1x128xf32>
    %cst_16 = arith.constant 0.000000e+00 : f32
    %14 = vector.broadcast %cst_16 : f32 to vector<8x128xf32>
    %c0_i32_17 = arith.constant 0 : i32
    %c8_i32 = arith.constant 8 : i32
    %15 = arith.muli %c0_i32_17, %c8_i32 : i32
    %16 = tpu.assume_multiple %15, 8 : i32
    %17 = arith.truncf %14 : vector<8x128xf32> to vector<8x128xbf16>
    %cst_18 = arith.constant dense<0.000000e+00> : vector<8x384xf32>
    %18 = tpu.matmul %17, %9, %cst_18 {dimension_numbers = #tpu.dot_dimension_numbers<[1], [0], [0], [1], [0, 0, 1, 1], [], []>} : vector<8x128xbf16>, vector<128x384xbf16>, vector<8x384xf32> -> vector<8x384xf32>
    %19 = arith.index_cast %16 : i32 to index
    %c0_19 = arith.constant 0 : index
    %20 = vector.load %arg9[%19, %c0_19] : memref<64x384xf32, #tpu.memory_space<vmem>>, vector<8x384xf32>
    %21 = vector.broadcast %11 : vector<1x384xf32> to vector<8x384xf32>
    %22 = arith.addf %20, %21 : vector<8x384xf32>
    %23 = vector.extract_strided_slice %22 {offsets = [0, 0], sizes = [8, 128], strides = [1, 1]} : vector<8x384xf32> to vector<8x128xf32>
    %24 = vector.extract_strided_slice %18 {offsets = [0, 0], sizes = [8, 128], strides = [1, 1]} : vector<8x384xf32> to vector<8x128xf32>
    %25 = arith.addf %23, %24 : vector<8x128xf32>
    %26 = arith.negf %25 : vector<8x128xf32>
    %27 = math.exp %26 : vector<8x128xf32>
    %cst_20 = arith.constant 1.000000e+00 : f32
    %28 = vector.broadcast %cst_20 : f32 to vector<8x128xf32>
    %29 = arith.addf %28, %27 : vector<8x128xf32>
    %30 = arith.divf %28, %29 : vector<8x128xf32>
    %31 = vector.extract_strided_slice %22 {offsets = [0, 128], sizes = [8, 128], strides = [1, 1]} : vector<8x384xf32> to vector<8x128xf32>
    %32 = vector.extract_strided_slice %18 {offsets = [0, 128], sizes = [8, 128], strides = [1, 1]} : vector<8x384xf32> to vector<8x128xf32>
    %33 = arith.addf %31, %32 : vector<8x128xf32>
    %34 = arith.negf %33 : vector<8x128xf32>
    %35 = math.exp %34 : vector<8x128xf32>
    %cst_21 = arith.constant 1.000000e+00 : f32
    %36 = vector.broadcast %cst_21 : f32 to vector<8x128xf32>
    %37 = arith.addf %36, %35 : vector<8x128xf32>
    %38 = arith.divf %36, %37 : vector<8x128xf32>
    %39 = vector.extract_strided_slice %22 {offsets = [0, 256], sizes = [8, 128], strides = [1, 1]} : vector<8x384xf32> to vector<8x128xf32>
    %40 = vector.extract_strided_slice %18 {offsets = [0, 256], sizes = [8, 128], strides = [1, 1]} : vector<8x384xf32> to vector<8x128xf32>
    %41 = vector.broadcast %13 : vector<1x128xf32> to vector<8x128xf32>
    %42 = arith.addf %40, %41 : vector<8x128xf32>
    %43 = arith.mulf %30, %42 : vector<8x128xf32>
    %44 = arith.addf %39, %43 : vector<8x128xf32>
    %45 = math.tanh %44 : vector<8x128xf32>
    %46 = arith.subf %14, %45 : vector<8x128xf32>
    %47 = arith.mulf %38, %46 : vector<8x128xf32>
    %48 = arith.addf %45, %47 : vector<8x128xf32>
    %49 = arith.truncf %48 : vector<8x128xf32> to vector<8x128xbf16>
    %50 = arith.index_cast %16 : i32 to index
    %c0_22 = arith.constant 0 : index
    %51 = vector.load %arg10[%50, %c0_22] : memref<64x128xbf16, #tpu.memory_space<vmem>>, vector<8x128xbf16>
    tpu.vector_store %arg10[%50, %c0_22], %49 {strides = array<i32>} : memref<64x128xbf16, #tpu.memory_space<vmem>>, vector<8x128xbf16>,
    %c1_i32 = arith.constant 1 : i32
    %c8_i32_23 = arith.constant 8 : i32
    %52 = arith.muli %c1_i32, %c8_i32_23 : i32
    %53 = tpu.assume_multiple %52, 8 : i32
    %54 = arith.truncf %48 : vector<8x128xf32> to vector<8x128xbf16>
    %cst_24 = arith.constant dense<0.000000e+00> : vector<8x384xf32>
    %55 = tpu.matmul %54, %9, %cst_24 {dimension_numbers = #tpu.dot_dimension_numbers<[1], [0], [0], [1], [0, 0, 1, 1], [], []>} : vector<8x128xbf16>, vector<128x384xbf16>, vector<8x384xf32> -> vector<8x384xf32>
    %56 = arith.index_cast %53 : i32 to index
    %c0_25 = arith.constant 0 : index
    %57 = vector.load %arg9[%56, %c0_25] : memref<64x384xf32, #tpu.memory_space<vmem>>, vector<8x384xf32>
    %58 = vector.broadcast %11 : vector<1x384xf32> to vector<8x384xf32>
    %59 = arith.addf %57, %58 : vector<8x384xf32>
    %60 = vector.extract_strided_slice %59 {offsets = [0, 0], sizes = [8, 128], strides = [1, 1]} : vector<8x384xf32> to vector<8x128xf32>
    %61 = vector.extract_strided_slice %55 {offsets = [0, 0], sizes = [8, 128], strides = [1, 1]} : vector<8x384xf32> to vector<8x128xf32>
    %62 = arith.addf %60, %61 : vector<8x128xf32>
    %63 = arith.negf %62 : vector<8x128xf32>
    %64 = math.exp %63 : vector<8x128xf32>
    %cst_26 = arith.constant 1.000000e+00 : f32
    %65 = vector.broadcast %cst_26 : f32 to vector<8x128xf32>
    %66 = arith.addf %65, %64 : vector<8x128xf32>
    %67 = arith.divf %65, %66 : vector<8x128xf32>
    %68 = vector.extract_strided_slice %59 {offsets = [0, 128], sizes = [8, 128], strides = [1, 1]} : vector<8x384xf32> to vector<8x128xf32>
    %69 = vector.extract_strided_slice %55 {offsets = [0, 128], sizes = [8, 128], strides = [1, 1]} : vector<8x384xf32> to vector<8x128xf32>
    %70 = arith.addf %68, %69 : vector<8x128xf32>
    %71 = arith.negf %70 : vector<8x128xf32>
    %72 = math.exp %71 : vector<8x128xf32>
    %cst_27 = arith.constant 1.000000e+00 : f32
    %73 = vector.broadcast %cst_27 : f32 to vector<8x128xf32>
    %74 = arith.addf %73, %72 : vector<8x128xf32>
    %75 = arith.divf %73, %74 : vector<8x128xf32>
    %76 = vector.extract_strided_slice %59 {offsets = [0, 256], sizes = [8, 128], strides = [1, 1]} : vector<8x384xf32> to vector<8x128xf32>
    %77 = vector.extract_strided_slice %55 {offsets = [0, 256], sizes = [8, 128], strides = [1, 1]} : vector<8x384xf32> to vector<8x128xf32>
    %78 = vector.broadcast %13 : vector<1x128xf32> to vector<8x128xf32>
    %79 = arith.addf %77, %78 : vector<8x128xf32>
    %80 = arith.mulf %67, %79 : vector<8x128xf32>
    %81 = arith.addf %76, %80 : vector<8x128xf32>
    %82 = math.tanh %81 : vector<8x128xf32>
    %83 = arith.subf %48, %82 : vector<8x128xf32>
    %84 = arith.mulf %75, %83 : vector<8x128xf32>
    %85 = arith.addf %82, %84 : vector<8x128xf32>
    %86 = arith.truncf %85 : vector<8x128xf32> to vector<8x128xbf16>
    %87 = arith.index_cast %53 : i32 to index
    %c0_28 = arith.constant 0 : index
    %88 = vector.load %arg10[%87, %c0_28] : memref<64x128xbf16, #tpu.memory_space<vmem>>, vector<8x128xbf16>
    tpu.vector_store %arg10[%87, %c0_28], %86 {strides = array<i32>} : memref<64x128xbf16, #tpu.memory_space<vmem>>, vector<8x128xbf16>,
    %c2_i32 = arith.constant 2 : i32
    %c8_i32_29 = arith.constant 8 : i32
    %89 = arith.muli %c2_i32, %c8_i32_29 : i32
    %90 = tpu.assume_multiple %89, 8 : i32
    %91 = arith.truncf %85 : vector<8x128xf32> to vector<8x128xbf16>
    %cst_30 = arith.constant dense<0.000000e+00> : vector<8x384xf32>
    %92 = tpu.matmul %91, %9, %cst_30 {dimension_numbers = #tpu.dot_dimension_numbers<[1], [0], [0], [1], [0, 0, 1, 1], [], []>} : vector<8x128xbf16>, vector<128x384xbf16>, vector<8x384xf32> -> vector<8x384xf32>
    %93 = arith.index_cast %90 : i32 to index
    %c0_31 = arith.constant 0 : index
    %94 = vector.load %arg9[%93, %c0_31] : memref<64x384xf32, #tpu.memory_space<vmem>>, vector<8x384xf32>
    %95 = vector.broadcast %11 : vector<1x384xf32> to vector<8x384xf32>
    %96 = arith.addf %94, %95 : vector<8x384xf32>
    %97 = vector.extract_strided_slice %96 {offsets = [0, 0], sizes = [8, 128], strides = [1, 1]} : vector<8x384xf32> to vector<8x128xf32>
    %98 = vector.extract_strided_slice %92 {offsets = [0, 0], sizes = [8, 128], strides = [1, 1]} : vector<8x384xf32> to vector<8x128xf32>
    %99 = arith.addf %97, %98 : vector<8x128xf32>
    %100 = arith.negf %99 : vector<8x128xf32>
    %101 = math.exp %100 : vector<8x128xf32>
    %cst_32 = arith.constant 1.000000e+00 : f32
    %102 = vector.broadcast %cst_32 : f32 to vector<8x128xf32>
    %103 = arith.addf %102, %101 : vector<8x128xf32>
    %104 = arith.divf %102, %103 : vector<8x128xf32>
    %105 = vector.extract_strided_slice %96 {offsets = [0, 128], sizes = [8, 128], strides = [1, 1]} : vector<8x384xf32> to vector<8x128xf32>
    %106 = vector.extract_strided_slice %92 {offsets = [0, 128], sizes = [8, 128], strides = [1, 1]} : vector<8x384xf32> to vector<8x128xf32>
    %107 = arith.addf %105, %106 : vector<8x128xf32>
    %108 = arith.negf %107 : vector<8x128xf32>
    %109 = math.exp %108 : vector<8x128xf32>
    %cst_33 = arith.constant 1.000000e+00 : f32
    %110 = vector.broadcast %cst_33 : f32 to vector<8x128xf32>
    %111 = arith.addf %110, %109 : vector<8x128xf32>
    %112 = arith.divf %110, %111 : vector<8x128xf32>
    %113 = vector.extract_strided_slice %96 {offsets = [0, 256], sizes = [8, 128], strides = [1, 1]} : vector<8x384xf32> to vector<8x128xf32>
    %114 = vector.extract_strided_slice %92 {offsets = [0, 256], sizes = [8, 128], strides = [1, 1]} : vector<8x384xf32> to vector<8x128xf32>
    %115 = vector.broadcast %13 : vector<1x128xf32> to vector<8x128xf32>
    %116 = arith.addf %114, %115 : vector<8x128xf32>
    %117 = arith.mulf %104, %116 : vector<8x128xf32>
    %118 = arith.addf %113, %117 : vector<8x128xf32>
    %119 = math.tanh %118 : vector<8x128xf32>
    %120 = arith.subf %85, %119 : vector<8x128xf32>
    %121 = arith.mulf %112, %120 : vector<8x128xf32>
    %122 = arith.addf %119, %121 : vector<8x128xf32>
    %123 = arith.truncf %122 : vector<8x128xf32> to vector<8x128xbf16>
    %124 = arith.index_cast %90 : i32 to index
    %c0_34 = arith.constant 0 : index
    %125 = vector.load %arg10[%124, %c0_34] : memref<64x128xbf16, #tpu.memory_space<vmem>>, vector<8x128xbf16>
    tpu.vector_store %arg10[%124, %c0_34], %123 {strides = array<i32>} : memref<64x128xbf16, #tpu.memory_space<vmem>>, vector<8x128xbf16>,
    %c3_i32 = arith.constant 3 : i32
    %c8_i32_35 = arith.constant 8 : i32
    %126 = arith.muli %c3_i32, %c8_i32_35 : i32
    %127 = tpu.assume_multiple %126, 8 : i32
    %128 = arith.truncf %122 : vector<8x128xf32> to vector<8x128xbf16>
    %cst_36 = arith.constant dense<0.000000e+00> : vector<8x384xf32>
    %129 = tpu.matmul %128, %9, %cst_36 {dimension_numbers = #tpu.dot_dimension_numbers<[1], [0], [0], [1], [0, 0, 1, 1], [], []>} : vector<8x128xbf16>, vector<128x384xbf16>, vector<8x384xf32> -> vector<8x384xf32>
    %130 = arith.index_cast %127 : i32 to index
    %c0_37 = arith.constant 0 : index
    %131 = vector.load %arg9[%130, %c0_37] : memref<64x384xf32, #tpu.memory_space<vmem>>, vector<8x384xf32>
    %132 = vector.broadcast %11 : vector<1x384xf32> to vector<8x384xf32>
    %133 = arith.addf %131, %132 : vector<8x384xf32>
    %134 = vector.extract_strided_slice %133 {offsets = [0, 0], sizes = [8, 128], strides = [1, 1]} : vector<8x384xf32> to vector<8x128xf32>
    %135 = vector.extract_strided_slice %129 {offsets = [0, 0], sizes = [8, 128], strides = [1, 1]} : vector<8x384xf32> to vector<8x128xf32>
    %136 = arith.addf %134, %135 : vector<8x128xf32>
    %137 = arith.negf %136 : vector<8x128xf32>
    %138 = math.exp %137 : vector<8x128xf32>
    %cst_38 = arith.constant 1.000000e+00 : f32
    %139 = vector.broadcast %cst_38 : f32 to vector<8x128xf32>
    %140 = arith.addf %139, %138 : vector<8x128xf32>
    %141 = arith.divf %139, %140 : vector<8x128xf32>
    %142 = vector.extract_strided_slice %133 {offsets = [0, 128], sizes = [8, 128], strides = [1, 1]} : vector<8x384xf32> to vector<8x128xf32>
    %143 = vector.extract_strided_slice %129 {offsets = [0, 128], sizes = [8, 128], strides = [1, 1]} : vector<8x384xf32> to vector<8x128xf32>
    %144 = arith.addf %142, %143 : vector<8x128xf32>
    %145 = arith.negf %144 : vector<8x128xf32>
    %146 = math.exp %145 : vector<8x128xf32>
    %cst_39 = arith.constant 1.000000e+00 : f32
    %147 = vector.broadcast %cst_39 : f32 to vector<8x128xf32>
    %148 = arith.addf %147, %146 : vector<8x128xf32>
    %149 = arith.divf %147, %148 : vector<8x128xf32>
    %150 = vector.extract_strided_slice %133 {offsets = [0, 256], sizes = [8, 128], strides = [1, 1]} : vector<8x384xf32> to vector<8x128xf32>
    %151 = vector.extract_strided_slice %129 {offsets = [0, 256], sizes = [8, 128], strides = [1, 1]} : vector<8x384xf32> to vector<8x128xf32>
    %152 = vector.broadcast %13 : vector<1x128xf32> to vector<8x128xf32>
    %153 = arith.addf %151, %152 : vector<8x128xf32>
    %154 = arith.mulf %141, %153 : vector<8x128xf32>
    %155 = arith.addf %150, %154 : vector<8x128xf32>
    %156 = math.tanh %155 : vector<8x128xf32>
    %157 = arith.subf %122, %156 : vector<8x128xf32>
    %158 = arith.mulf %149, %157 : vector<8x128xf32>
    %159 = arith.addf %156, %158 : vector<8x128xf32>
    %160 = arith.truncf %159 : vector<8x128xf32> to vector<8x128xbf16>
    %161 = arith.index_cast %127 : i32 to index
    %c0_40 = arith.constant 0 : index
    %162 = vector.load %arg10[%161, %c0_40] : memref<64x128xbf16, #tpu.memory_space<vmem>>, vector<8x128xbf16>
    tpu.vector_store %arg10[%161, %c0_40], %160 {strides = array<i32>} : memref<64x128xbf16, #tpu.memory_space<vmem>>, vector<8x128xbf16>,
    %c4_i32 = arith.constant 4 : i32
    %c8_i32_41 = arith.constant 8 : i32
    %163 = arith.muli %c4_i32, %c8_i32_41 : i32
    %164 = tpu.assume_multiple %163, 8 : i32
    %165 = arith.truncf %159 : vector<8x128xf32> to vector<8x128xbf16>
    %cst_42 = arith.constant dense<0.000000e+00> : vector<8x384xf32>
    %166 = tpu.matmul %165, %9, %cst_42 {dimension_numbers = #tpu.dot_dimension_numbers<[1], [0], [0], [1], [0, 0, 1, 1], [], []>} : vector<8x128xbf16>, vector<128x384xbf16>, vector<8x384xf32> -> vector<8x384xf32>
    %167 = arith.index_cast %164 : i32 to index
    %c0_43 = arith.constant 0 : index
    %168 = vector.load %arg9[%167, %c0_43] : memref<64x384xf32, #tpu.memory_space<vmem>>, vector<8x384xf32>
    %169 = vector.broadcast %11 : vector<1x384xf32> to vector<8x384xf32>
    %170 = arith.addf %168, %169 : vector<8x384xf32>
    %171 = vector.extract_strided_slice %170 {offsets = [0, 0], sizes = [8, 128], strides = [1, 1]} : vector<8x384xf32> to vector<8x128xf32>
    %172 = vector.extract_strided_slice %166 {offsets = [0, 0], sizes = [8, 128], strides = [1, 1]} : vector<8x384xf32> to vector<8x128xf32>
    %173 = arith.addf %171, %172 : vector<8x128xf32>
    %174 = arith.negf %173 : vector<8x128xf32>
    %175 = math.exp %174 : vector<8x128xf32>
    %cst_44 = arith.constant 1.000000e+00 : f32
    %176 = vector.broadcast %cst_44 : f32 to vector<8x128xf32>
    %177 = arith.addf %176, %175 : vector<8x128xf32>
    %178 = arith.divf %176, %177 : vector<8x128xf32>
    %179 = vector.extract_strided_slice %170 {offsets = [0, 128], sizes = [8, 128], strides = [1, 1]} : vector<8x384xf32> to vector<8x128xf32>
    %180 = vector.extract_strided_slice %166 {offsets = [0, 128], sizes = [8, 128], strides = [1, 1]} : vector<8x384xf32> to vector<8x128xf32>
    %181 = arith.addf %179, %180 : vector<8x128xf32>
    %182 = arith.negf %181 : vector<8x128xf32>
    %183 = math.exp %182 : vector<8x128xf32>
    %cst_45 = arith.constant 1.000000e+00 : f32
    %184 = vector.broadcast %cst_45 : f32 to vector<8x128xf32>
    %185 = arith.addf %184, %183 : vector<8x128xf32>
    %186 = arith.divf %184, %185 : vector<8x128xf32>
    %187 = vector.extract_strided_slice %170 {offsets = [0, 256], sizes = [8, 128], strides = [1, 1]} : vector<8x384xf32> to vector<8x128xf32>
    %188 = vector.extract_strided_slice %166 {offsets = [0, 256], sizes = [8, 128], strides = [1, 1]} : vector<8x384xf32> to vector<8x128xf32>
    %189 = vector.broadcast %13 : vector<1x128xf32> to vector<8x128xf32>
    %190 = arith.addf %188, %189 : vector<8x128xf32>
    %191 = arith.mulf %178, %190 : vector<8x128xf32>
    %192 = arith.addf %187, %191 : vector<8x128xf32>
    %193 = math.tanh %192 : vector<8x128xf32>
    %194 = arith.subf %159, %193 : vector<8x128xf32>
    %195 = arith.mulf %186, %194 : vector<8x128xf32>
    %196 = arith.addf %193, %195 : vector<8x128xf32>
    %197 = arith.truncf %196 : vector<8x128xf32> to vector<8x128xbf16>
    %198 = arith.index_cast %164 : i32 to index
    %c0_46 = arith.constant 0 : index
    %199 = vector.load %arg10[%198, %c0_46] : memref<64x128xbf16, #tpu.memory_space<vmem>>, vector<8x128xbf16>
    tpu.vector_store %arg10[%198, %c0_46], %197 {strides = array<i32>} : memref<64x128xbf16, #tpu.memory_space<vmem>>, vector<8x128xbf16>,
    %c5_i32 = arith.constant 5 : i32
    %c8_i32_47 = arith.constant 8 : i32
    %200 = arith.muli %c5_i32, %c8_i32_47 : i32
    %201 = tpu.assume_multiple %200, 8 : i32
    %202 = arith.truncf %196 : vector<8x128xf32> to vector<8x128xbf16>
    %cst_48 = arith.constant dense<0.000000e+00> : vector<8x384xf32>
    %203 = tpu.matmul %202, %9, %cst_48 {dimension_numbers = #tpu.dot_dimension_numbers<[1], [0], [0], [1], [0, 0, 1, 1], [], []>} : vector<8x128xbf16>, vector<128x384xbf16>, vector<8x384xf32> -> vector<8x384xf32>
    %204 = arith.index_cast %201 : i32 to index
    %c0_49 = arith.constant 0 : index
    %205 = vector.load %arg9[%204, %c0_49] : memref<64x384xf32, #tpu.memory_space<vmem>>, vector<8x384xf32>
    %206 = vector.broadcast %11 : vector<1x384xf32> to vector<8x384xf32>
    %207 = arith.addf %205, %206 : vector<8x384xf32>
    %208 = vector.extract_strided_slice %207 {offsets = [0, 0], sizes = [8, 128], strides = [1, 1]} : vector<8x384xf32> to vector<8x128xf32>
    %209 = vector.extract_strided_slice %203 {offsets = [0, 0], sizes = [8, 128], strides = [1, 1]} : vector<8x384xf32> to vector<8x128xf32>
    %210 = arith.addf %208, %209 : vector<8x128xf32>
    %211 = arith.negf %210 : vector<8x128xf32>
    %212 = math.exp %211 : vector<8x128xf32>
    %cst_50 = arith.constant 1.000000e+00 : f32
    %213 = vector.broadcast %cst_50 : f32 to vector<8x128xf32>
    %214 = arith.addf %213, %212 : vector<8x128xf32>
    %215 = arith.divf %213, %214 : vector<8x128xf32>
    %216 = vector.extract_strided_slice %207 {offsets = [0, 128], sizes = [8, 128], strides = [1, 1]} : vector<8x384xf32> to vector<8x128xf32>
    %217 = vector.extract_strided_slice %203 {offsets = [0, 128], sizes = [8, 128], strides = [1, 1]} : vector<8x384xf32> to vector<8x128xf32>
    %218 = arith.addf %216, %217 : vector<8x128xf32>
    %219 = arith.negf %218 : vector<8x128xf32>
    %220 = math.exp %219 : vector<8x128xf32>
    %cst_51 = arith.constant 1.000000e+00 : f32
    %221 = vector.broadcast %cst_51 : f32 to vector<8x128xf32>
    %222 = arith.addf %221, %220 : vector<8x128xf32>
    %223 = arith.divf %221, %222 : vector<8x128xf32>
    %224 = vector.extract_strided_slice %207 {offsets = [0, 256], sizes = [8, 128], strides = [1, 1]} : vector<8x384xf32> to vector<8x128xf32>
    %225 = vector.extract_strided_slice %203 {offsets = [0, 256], sizes = [8, 128], strides = [1, 1]} : vector<8x384xf32> to vector<8x128xf32>
    %226 = vector.broadcast %13 : vector<1x128xf32> to vector<8x128xf32>
    %227 = arith.addf %225, %226 : vector<8x128xf32>
    %228 = arith.mulf %215, %227 : vector<8x128xf32>
    %229 = arith.addf %224, %228 : vector<8x128xf32>
    %230 = math.tanh %229 : vector<8x128xf32>
    %231 = arith.subf %196, %230 : vector<8x128xf32>
    %232 = arith.mulf %223, %231 : vector<8x128xf32>
    %233 = arith.addf %230, %232 : vector<8x128xf32>
    %234 = arith.truncf %233 : vector<8x128xf32> to vector<8x128xbf16>
    %235 = arith.index_cast %201 : i32 to index
    %c0_52 = arith.constant 0 : index
    %236 = vector.load %arg10[%235, %c0_52] : memref<64x128xbf16, #tpu.memory_space<vmem>>, vector<8x128xbf16>
    tpu.vector_store %arg10[%235, %c0_52], %234 {strides = array<i32>} : memref<64x128xbf16, #tpu.memory_space<vmem>>, vector<8x128xbf16>,
    %c6_i32 = arith.constant 6 : i32
    %c8_i32_53 = arith.constant 8 : i32
    %237 = arith.muli %c6_i32, %c8_i32_53 : i32
    %238 = tpu.assume_multiple %237, 8 : i32
    %239 = arith.truncf %233 : vector<8x128xf32> to vector<8x128xbf16>
    %cst_54 = arith.constant dense<0.000000e+00> : vector<8x384xf32>
    %240 = tpu.matmul %239, %9, %cst_54 {dimension_numbers = #tpu.dot_dimension_numbers<[1], [0], [0], [1], [0, 0, 1, 1], [], []>} : vector<8x128xbf16>, vector<128x384xbf16>, vector<8x384xf32> -> vector<8x384xf32>
    %241 = arith.index_cast %238 : i32 to index
    %c0_55 = arith.constant 0 : index
    %242 = vector.load %arg9[%241, %c0_55] : memref<64x384xf32, #tpu.memory_space<vmem>>, vector<8x384xf32>
    %243 = vector.broadcast %11 : vector<1x384xf32> to vector<8x384xf32>
    %244 = arith.addf %242, %243 : vector<8x384xf32>
    %245 = vector.extract_strided_slice %244 {offsets = [0, 0], sizes = [8, 128], strides = [1, 1]} : vector<8x384xf32> to vector<8x128xf32>
    %246 = vector.extract_strided_slice %240 {offsets = [0, 0], sizes = [8, 128], strides = [1, 1]} : vector<8x384xf32> to vector<8x128xf32>
    %247 = arith.addf %245, %246 : vector<8x128xf32>
    %248 = arith.negf %247 : vector<8x128xf32>
    %249 = math.exp %248 : vector<8x128xf32>
    %cst_56 = arith.constant 1.000000e+00 : f32
    %250 = vector.broadcast %cst_56 : f32 to vector<8x128xf32>
    %251 = arith.addf %250, %249 : vector<8x128xf32>
    %252 = arith.divf %250, %251 : vector<8x128xf32>
    %253 = vector.extract_strided_slice %244 {offsets = [0, 128], sizes = [8, 128], strides = [1, 1]} : vector<8x384xf32> to vector<8x128xf32>
    %254 = vector.extract_strided_slice %240 {offsets = [0, 128], sizes = [8, 128], strides = [1, 1]} : vector<8x384xf32> to vector<8x128xf32>
    %255 = arith.addf %253, %254 : vector<8x128xf32>
    %256 = arith.negf %255 : vector<8x128xf32>
    %257 = math.exp %256 : vector<8x128xf32>
    %cst_57 = arith.constant 1.000000e+00 : f32
    %258 = vector.broadcast %cst_57 : f32 to vector<8x128xf32>
    %259 = arith.addf %258, %257 : vector<8x128xf32>
    %260 = arith.divf %258, %259 : vector<8x128xf32>
    %261 = vector.extract_strided_slice %244 {offsets = [0, 256], sizes = [8, 128], strides = [1, 1]} : vector<8x384xf32> to vector<8x128xf32>
    %262 = vector.extract_strided_slice %240 {offsets = [0, 256], sizes = [8, 128], strides = [1, 1]} : vector<8x384xf32> to vector<8x128xf32>
    %263 = vector.broadcast %13 : vector<1x128xf32> to vector<8x128xf32>
    %264 = arith.addf %262, %263 : vector<8x128xf32>
    %265 = arith.mulf %252, %264 : vector<8x128xf32>
    %266 = arith.addf %261, %265 : vector<8x128xf32>
    %267 = math.tanh %266 : vector<8x128xf32>
    %268 = arith.subf %233, %267 : vector<8x128xf32>
    %269 = arith.mulf %260, %268 : vector<8x128xf32>
    %270 = arith.addf %267, %269 : vector<8x128xf32>
    %271 = arith.truncf %270 : vector<8x128xf32> to vector<8x128xbf16>
    %272 = arith.index_cast %238 : i32 to index
    %c0_58 = arith.constant 0 : index
    %273 = vector.load %arg10[%272, %c0_58] : memref<64x128xbf16, #tpu.memory_space<vmem>>, vector<8x128xbf16>
    tpu.vector_store %arg10[%272, %c0_58], %271 {strides = array<i32>} : memref<64x128xbf16, #tpu.memory_space<vmem>>, vector<8x128xbf16>,
    %c7_i32 = arith.constant 7 : i32
    %c8_i32_59 = arith.constant 8 : i32
    %274 = arith.muli %c7_i32, %c8_i32_59 : i32
    %275 = tpu.assume_multiple %274, 8 : i32
    %276 = arith.truncf %270 : vector<8x128xf32> to vector<8x128xbf16>
    %cst_60 = arith.constant dense<0.000000e+00> : vector<8x384xf32>
    %277 = tpu.matmul %276, %9, %cst_60 {dimension_numbers = #tpu.dot_dimension_numbers<[1], [0], [0], [1], [0, 0, 1, 1], [], []>} : vector<8x128xbf16>, vector<128x384xbf16>, vector<8x384xf32> -> vector<8x384xf32>
    %278 = arith.index_cast %275 : i32 to index
    %c0_61 = arith.constant 0 : index
    %279 = vector.load %arg9[%278, %c0_61] : memref<64x384xf32, #tpu.memory_space<vmem>>, vector<8x384xf32>
    %280 = vector.broadcast %11 : vector<1x384xf32> to vector<8x384xf32>
    %281 = arith.addf %279, %280 : vector<8x384xf32>
    %282 = vector.extract_strided_slice %281 {offsets = [0, 0], sizes = [8, 128], strides = [1, 1]} : vector<8x384xf32> to vector<8x128xf32>
    %283 = vector.extract_strided_slice %277 {offsets = [0, 0], sizes = [8, 128], strides = [1, 1]} : vector<8x384xf32> to vector<8x128xf32>
    %284 = arith.addf %282, %283 : vector<8x128xf32>
    %285 = arith.negf %284 : vector<8x128xf32>
    %286 = math.exp %285 : vector<8x128xf32>
    %cst_62 = arith.constant 1.000000e+00 : f32
    %287 = vector.broadcast %cst_62 : f32 to vector<8x128xf32>
    %288 = arith.addf %287, %286 : vector<8x128xf32>
    %289 = arith.divf %287, %288 : vector<8x128xf32>
    %290 = vector.extract_strided_slice %281 {offsets = [0, 128], sizes = [8, 128], strides = [1, 1]} : vector<8x384xf32> to vector<8x128xf32>
    %291 = vector.extract_strided_slice %277 {offsets = [0, 128], sizes = [8, 128], strides = [1, 1]} : vector<8x384xf32> to vector<8x128xf32>
    %292 = arith.addf %290, %291 : vector<8x128xf32>
    %293 = arith.negf %292 : vector<8x128xf32>
    %294 = math.exp %293 : vector<8x128xf32>
    %cst_63 = arith.constant 1.000000e+00 : f32
    %295 = vector.broadcast %cst_63 : f32 to vector<8x128xf32>
    %296 = arith.addf %295, %294 : vector<8x128xf32>
    %297 = arith.divf %295, %296 : vector<8x128xf32>
    %298 = vector.extract_strided_slice %281 {offsets = [0, 256], sizes = [8, 128], strides = [1, 1]} : vector<8x384xf32> to vector<8x128xf32>
    %299 = vector.extract_strided_slice %277 {offsets = [0, 256], sizes = [8, 128], strides = [1, 1]} : vector<8x384xf32> to vector<8x128xf32>
    %300 = vector.broadcast %13 : vector<1x128xf32> to vector<8x128xf32>
    %301 = arith.addf %299, %300 : vector<8x128xf32>
    %302 = arith.mulf %289, %301 : vector<8x128xf32>
    %303 = arith.addf %298, %302 : vector<8x128xf32>
    %304 = math.tanh %303 : vector<8x128xf32>
    %305 = arith.subf %270, %304 : vector<8x128xf32>
    %306 = arith.mulf %297, %305 : vector<8x128xf32>
    %307 = arith.addf %304, %306 : vector<8x128xf32>
    %308 = arith.truncf %307 : vector<8x128xf32> to vector<8x128xbf16>
    %309 = arith.index_cast %275 : i32 to index
    %c0_64 = arith.constant 0 : index
    %310 = vector.load %arg10[%309, %c0_64] : memref<64x128xbf16, #tpu.memory_space<vmem>>, vector<8x128xbf16>
    tpu.vector_store %arg10[%309, %c0_64], %308 {strides = array<i32>} : memref<64x128xbf16, #tpu.memory_space<vmem>>, vector<8x128xbf16>,
    %c8_i32_65 = arith.constant 8 : i32
    %c1_i32_66 = arith.constant 1 : i32
    %311 = arith.cmpi eq, %arg0, %c1_i32_66 : i32
    %312 = arith.extui %311 : i1 to i32
    %c0_i32_67 = arith.constant 0 : i32
    %313 = arith.cmpi ne, %312, %c0_i32_67 : i32
    scf.if %313 {
      %314 = arith.truncf %307 : vector<8x128xf32> to vector<8x128xbf16>
      %c0_68 = arith.constant 0 : index
      %c0_69 = arith.constant 0 : index
      %315 = vector.load %arg6[%c0_68, %c0_69] : memref<128x128xbf16, #tpu.memory_space<vmem>>, vector<128x128xbf16>
      %cst_70 = arith.constant dense<0.000000e+00> : vector<8x128xf32>
      %316 = tpu.matmul %314, %315, %cst_70 {dimension_numbers = #tpu.dot_dimension_numbers<[1], [0], [0], [1], [0, 0, 1, 1], [], []>} : vector<8x128xbf16>, vector<128x128xbf16>, vector<8x128xf32> -> vector<8x128xf32>
      %c0_71 = arith.constant 0 : index
      %c0_72 = arith.constant 0 : index
      %317 = vector.load %arg7[%c0_71, %c0_72] : memref<1x128xf32, #tpu.memory_space<vmem>>, vector<1x128xf32>
      %318 = vector.broadcast %317 : vector<1x128xf32> to vector<8x128xf32>
      %319 = arith.addf %316, %318 : vector<8x128xf32>
      %c0_73 = arith.constant 0 : index
      %c0_74 = arith.constant 0 : index
      %320 = vector.load %arg8[%c0_73, %c0_74] : memref<8x128xf32, #tpu.memory_space<vmem>>, vector<8x128xf32>
      tpu.vector_store %arg8[%c0_73, %c0_74], %319 {strides = array<i32>} : memref<8x128xf32, #tpu.memory_space<vmem>>, vector<8x128xf32>,
    } else {
    }
    return
  }
  func.func @transform_0(%arg0: i32) -> (i32, i32) {
    %c0_i32 = arith.constant 0 : i32
    %c0_i32_0 = arith.constant 0 : i32
    %c0_i32_1 = arith.constant 0 : i32
    return %c0_i32, %c0_i32_0 : i32, i32
  }
  func.func @transform_1(%arg0: i32) -> (i32, i32, i32) {
    %c0_i32 = arith.constant 0 : i32
    %c0_i32_0 = arith.constant 0 : i32
    %c0_i32_1 = arith.constant 0 : i32
    return %arg0, %c0_i32, %c0_i32_0 : i32, i32, i32
  }
  func.func @transform_2(%arg0: i32) -> (i32, i32, i32) {
    %c0_i32 = arith.constant 0 : i32
    %c0_i32_0 = arith.constant 0 : i32
    %c0_i32_1 = arith.constant 0 : i32
    return %arg0, %c0_i32, %c0_i32_0 : i32, i32, i32
  }
  func.func @transform_3(%arg0: i32) -> (i32, i32, i32) {
    %c0_i32 = arith.constant 0 : i32
    %c0_i32_0 = arith.constant 0 : i32
    %c0_i32_1 = arith.constant 0 : i32
    return %arg0, %c0_i32, %c0_i32_0 : i32, i32, i32
  }
  func.func @transform_4(%arg0: i32) -> (i32, i32, i32) {
    %c0_i32 = arith.constant 0 : i32
    %c0_i32_0 = arith.constant 0 : i32
    %c0_i32_1 = arith.constant 0 : i32
    return %arg0, %c0_i32, %c0_i32_0 : i32, i32, i32
  }
  func.func @transform_5(%arg0: i32) -> (i32, i32) {
    %c0_i32 = arith.constant 0 : i32
    %c0_i32_0 = arith.constant 0 : i32
    %c0_i32_1 = arith.constant 0 : i32
    return %c0_i32, %c0_i32_0 : i32, i32
  }
  func.func @transform_6(%arg0: i32) -> (i32, i32) {
    %c0_i32 = arith.constant 0 : i32
    %c0_i32_0 = arith.constant 0 : i32
    %c0_i32_1 = arith.constant 0 : i32
    return %c0_i32, %c0_i32_0 : i32, i32
  }
  func.func @transform_7(%arg0: i32) -> (i32, i32) {
    %c0_i32 = arith.constant 0 : i32
    %c0_i32_0 = arith.constant 0 : i32
    %c0_i32_1 = arith.constant 0 : i32
    return %c0_i32, %c0_i32_0 : i32, i32
  }
}

</mosaic_0001>

<bundles_post_ra>
// kernel: tpu_custom_call.1
= control target key start
LH: loop header
LB: loop body
LE: loop exit
PB: predicated region body
PF: predicated region fallthrough
CT: control target
= control target key end

     0   :  { %s3820_s0 = inlined_call_operand.hbm [shape: bf16[64,128], index: 0, kind: input, shape index: {}]   ;;  %s3821_s1 = inlined_call_operand.hbm [shape: bf16[2,128,384], index: 1, kind: input, shape index: {}]   ;;  %s3822_s2 = inlined_call_operand.hbm [shape: bf16[2,128,384], index: 2, kind: input, shape index: {}]   ;;  %s3823_s3 = inlined_call_operand.hbm [shape: f32[2,1,384], index: 3, kind: input, shape index: {}]   ;;  %s3824_s4 = inlined_call_operand.vmem [shape: f32[2,1,128], index: 4, kind: input, shape index: {}]   ;;  %s3825_s5 = inlined_call_operand.hbm [shape: bf16[128,128], index: 5, kind: input, shape index: {}]   ;;  %s3826_s6 = inlined_call_operand.vmem [shape: f32[1,128], index: 6, kind: input, shape index: {}]   ;;  %s3827_s7 = inlined_call_operand.hbm [shape: f32[8,128], index: 7, kind: output, shape index: {}]  }
   0x1   :  { %3843 = sst [smem:[#allocation24_spill]] %s3821_s1 }
   0x2   :  { %3844 = sst [smem:[#allocation25_spill]] %s3825_s5 }
   0x3   :  { %12 = vsyncpa [#allocation5], 0 }
   0x4   :  { %13 = vsyncpa [#allocation8], 0 }
   0x5   :  { %15 = vsyncpa [#allocation8 + $0x1], 0 }
   0x6   :  { %16 = vsyncpa [#allocation11], 0 }
   0x7   :  { %18 = vsyncpa [#allocation11 + $0x1], 0 }
   0x8   :  { %19 = vsyncpa [#allocation6], 0  ;;  %s3054_s24 = smov 0   ;;  %s3056_s25 = smov 0  }
   0x9   :  { %s3058_s26 = smov 0   ;;  %s3060_s27 = smov 0  }
   0xa LB: > { %s3073_s28 = sadd.s32 4294967295, %s2997_s27   ;;  %s3076_s29 = sadd.s32 1, %s2997_s27   ;;  %s2997_s27 = sphi %s3060_s27, %s3882_s27   ;;  %s2993_s26 = sphi %s3058_s26, %s3881_s26   ;;  %s2989_s25 = sphi %s3056_s25, %s3880_s25   ;;  %s2985_s24 = sphi %s3054_s24, %s3879_s24  }
   0xb   : > { %s50_s30 = ssub.s32 %s2997_s27, %s3076_s29  ;;  %s53_s8 = sadd.s32 1, %s2993_s26 }
   0xc   : > { %p51_p0 = scmp.eq.s32.totalorder %s50_s30, 0  ;;  %p60_p1 = scmp.ne.s32.totalorder %s2993_s26, %s2989_s25 }
   0xd   : > { %p61_p2 = scmp.eq.s32.totalorder %s2997_s27, 0  ;;  %p66_p3 = scmp.ne.s32.totalorder %s2989_s25, %s2985_s24 }
   0xe   : > { %s3086_s9 = scalar_select %p51_p0, %s2993_s26, %s53_s8  }
   0xf   : > { %p3088_p4 = por %p61_p2, %p60_p1  ;;  %p3832_p5 = scmp.eq.s32.totalorder %s3073_s28, 0 }
  0x10   : > { %3845 = sst [smem:[#allocation19_spill]] %s3086_s9  ;;  %p2127_p6 = scmp.ge.s32.totalorder %s2997_s27, 1 }
  0x11   : > { %p218_p7 = scmp.lt.s32.totalorder %s2997_s27, 3  ;;  %p3097_p8 = por %p3832_p5, %p66_p3 }
  0x12   : > { %s2999_s13 = smov [#allocation12]   ;;  %p2563_p13 = scmp.lt.s32.totalorder %s2997_s27, 2 }
  0x13   : > { %s3847_s11 = scalar_select %p3097_p8, 1, 0 }
  0x14   : > { %p3102_p10 = pnand %p2127_p6, %p218_p7  ;;  %s243_s14 = sshll.u32 %s2999_s13, 4  ;;  %s244_s14 = int_to_ptr.vmem [resolvable:$true] %s243_s14 }
  0x15   : > { %s3831_s16 = sand.u32 1, %s2997_s27   ;;  %s3828_s17 = sand.u32 1, %s2993_s26  }
  0x16   : > { %s3848_s12 = scalar_select %p3102_p10, 1, 0 }
  0x17   : > { %p2544_p11 = pneg %p3102_p10  ;;  %s2798_s18 = scalar_lea.vmem %s244_s14, 1024 }
  0x18   : > { %p2799_p1 = scmp.ne.s32.totalorder %s244_s14, %s2798_s18  ;;  %p2806_p6 = scmp.lt.s32.totalorder %s244_s14, %s244_s14 }
  0x19   : > { %p3110_p12 = pnand %p2544_p11, %p3832_p5  ;;  %p2807_p7 = scmp.lt.s32.totalorder %s2798_s18, %s2798_s18 }
  0x1b   : > { %s3849_s15 = scalar_select %p3110_p12, 1, 0 }
  0x1c   : > { %p3834_p0 = pneg %p3110_p12  ;;  %p2808_p9 = por %p2807_p7, %p2806_p6 }
  0x1e   : > { %p2801_p2 = pnand %p2799_p1, %p3834_p0 }
  0x20   : > { %p2802_p3 = pneg %p2801_p2 }
  0x22   : > { %p2809_p11 = pnand %p2808_p9, %p2802_p3 }
  0x24   : > { %2812 = shalt.err (!%p2809_p11)
}
  0x25   : > { %s3829_s19 = smov 64   ;;  %s3830_s20 = smov 4  }
  0x26   : > { %s3850_s5 = sld [smem:[#allocation25_spill]]  ;;  %s3132_s23 = smul.u32 192, %s3828_s17 }
  0x27   : > { %p3138_p9 = pnand %p2563_p13, %p3088_p4  ;;  %s3833_s30 = smul.u32 3072, %s2997_s27 }
  0x28   : > { %s3852_s1 = sld [smem:[#allocation24_spill]]  ;;  %s3155_s10 = scalar_lea.sflag [#allocation8], %s3831_s16 }
  0x29   : > { %p3161_p13 = pneg %p3138_p9 }
  0x2c   : > { %2550 = dma.hbm_to_vmem [thread:$0]  (!%p3110_p12), %s3850_s5, 1024, %s244_s14, [#allocation11], %s3829_s19, %s3829_s19, %s3830_s20  }
  0x2d   : > { %s264_s14 = scalar_lea.vmem [#allocation7], %s3132_s23 }
  0x2e   : > { %s3148_s18 = scalar_lea.hbm %s3852_s1, %s3833_s30  ;;  %s271_s21 = sshll.u32 %s264_s14, 4  ;;  %s3151_s21 = int_to_ptr.vmem [resolvable:$true] %s271_s21 }
  0x2f   : > { %s2813_s22 = scalar_lea.hbm %s3148_s18, 3072  ;;  %s2818_s14 = scalar_lea.hbm %s3852_s1, 6144 }
  0x30   : > { %p2814_p4 = scmp.ne.s32.totalorder %s3148_s18, %s2813_s22  ;;  %p2819_p3 = scmp.lt.s32.totalorder %s3148_s18, %s3852_s1 }
  0x31   : > { %p2820_p6 = scmp.lt.s32.totalorder %s2818_s14, %s2813_s22 }
  0x32   : > { %p2816_p1 = pnand %p3161_p13, %p2814_p4 }
  0x33   : > { %p2821_p7 = por %p2820_p6, %p2819_p3 }
  0x34   : > { %p2817_p2 = pneg %p2816_p1 }
  0x36   : > { %p2822_p11 = pnand %p2821_p7, %p2817_p2 }
  0x38   : > { %2825 = shalt.err (!%p2822_p11)
}
  0x39   : > { %s2826_s16 = scalar_lea.vmem %s3151_s21, 3072  ;;  %s3002_s30 = smov [#allocation7]  }
  0x3a   : > { %p2827_p5 = scmp.ne.s32.totalorder %s3151_s21, %s2826_s16  ;;  %s2831_s8 = sshll.u32 %s3002_s30, 4  ;;  %s2832_s8 = int_to_ptr.vmem [resolvable:$false] %s2831_s8 }
  0x3b   : > { %s2833_s13 = scalar_lea.vmem %s2832_s8, 6144  ;;  %p2834_p0 = scmp.lt.s32.totalorder %s3151_s21, %s2832_s8 }
  0x3c   : > { %p2829_p4 = pnand %p2827_p5, %p3161_p13  ;;  %p2835_p8 = scmp.lt.s32.totalorder %s2833_s13, %s2826_s16 }
  0x3e   : > { %p2830_p1 = pneg %p2829_p4  ;;  %p2836_p10 = por %p2835_p8, %p2834_p0 }
  0x40   : > { %p2837_p12 = pnand %p2836_p10, %p2830_p1 }
  0x42   : > { %2840 = shalt.err (!%p2837_p12)
}
  0x43   : > { %s3003_s19 = smov 192   ;;  %s3004_s20 = smov 12  }
  0x44   : > { %2554 = dma.hbm_to_vmem [thread:$0]  (!%p3138_p9), %s3148_s18, 3072, %s3151_s21, %s3155_s10, %s3003_s19, %s3003_s19, %s3004_s20  }
  0x45   : > { %s3005_s30 = smov [#allocation4]   ;;  %s3854_s16 = smul.u32 3072, %s2997_s27 }
  0x46   : > { %s230_s22 = sshll.u32 %s3005_s30, 4  ;;  %s285_s1 = scalar_lea.vmem [#allocation9], %s3132_s23  ;;  %s231_s22 = int_to_ptr.vmem [resolvable:$true] %s230_s22 }
  0x47   : > { %s3192_s13 = scalar_lea.hbm %s3822_s2, %s3854_s16  ;;  %s292_s5 = sshll.u32 %s285_s1, 4  ;;  %s293_s5 = int_to_ptr.vmem [resolvable:$true] %s292_s5 }
  0x48   : > { %s2852_s9 = scalar_lea.vmem %s231_s22, 512  ;;  %p3855_p8 = scmp.ne.s32.totalorder %s3849_s15, 0 }
  0x49   : > { %p2853_p5 = scmp.ne.s32.totalorder %s231_s22, %s2852_s9  ;;  %p2860_p2 = scmp.lt.s32.totalorder %s231_s22, %s231_s22 }
  0x4a   : > { %p3856_p10 = pneg %p3855_p8  ;;  %p2861_p3 = scmp.lt.s32.totalorder %s2852_s9, %s2852_s9 }
  0x4c   : > { %p2855_p12 = pnand %p2853_p5, %p3856_p10  ;;  %p2862_p6 = por %p2861_p3, %p2860_p2 }
  0x4e   : > { %p2856_p0 = pneg %p2855_p12 }
  0x50   : > { %p2863_p7 = pnand %p2862_p6, %p2856_p0 }
  0x52   : > { %2866 = shalt.err (!%p2863_p7)
}
  0x53   : > { %s3857_s18 = smov 4   ;;  %s3858_s21 = smov 64  }
  0x54   : > { %2547 = dma.hbm_to_vmem [thread:$0]  (!%p3855_p8), %s3820_s0, 512, %s231_s22, [#allocation5], %s3858_s21, %s3858_s21, %s3857_s18  }
  0x55   : > { %s2867_s1 = scalar_lea.hbm %s3192_s13, 3072  ;;  %s2872_s15 = scalar_lea.hbm %s3822_s2, 6144 }
  0x56   : > { %p2868_p11 = scmp.ne.s32.totalorder %s3192_s13, %s2867_s1  ;;  %p2873_p5 = scmp.lt.s32.totalorder %s3192_s13, %s3822_s2 }
  0x57   : > { %p2874_p10 = scmp.lt.s32.totalorder %s2872_s15, %s2867_s1 }
  0x58   : > { %p2870_p4 = pnand %p2868_p11, %p3161_p13 }
  0x59   : > { %p2875_p12 = por %p2874_p10, %p2873_p5 }
  0x5a   : > { %p2871_p1 = pneg %p2870_p4 }
  0x5c   : > { %p2876_p0 = pnand %p2875_p12, %p2871_p1 }
  0x5e   : > { %2879 = shalt.err (!%p2876_p0)
}
  0x5f   : > { %s2880_s30 = scalar_lea.vmem %s293_s5, 3072  ;;  %s3006_s22 = smov [#allocation9]  }
  0x60   : > { %p2881_p8 = scmp.ne.s32.totalorder %s293_s5, %s2880_s30  ;;  %s2885_s18 = sshll.u32 %s3006_s22, 4  ;;  %s2886_s18 = int_to_ptr.vmem [resolvable:$false] %s2885_s18 }
  0x61   : > { %s2887_s21 = scalar_lea.vmem %s2886_s18, 6144  ;;  %p2888_p6 = scmp.lt.s32.totalorder %s293_s5, %s2886_s18 }
  0x62   : > { %p2883_p2 = pnand %p2881_p8, %p3161_p13  ;;  %p2889_p7 = scmp.lt.s32.totalorder %s2887_s21, %s2880_s30 }
  0x64   : > { %p2884_p3 = pneg %p2883_p2  ;;  %p2890_p11 = por %p2889_p7, %p2888_p6 }
  0x66   : > { %p2891_p4 = pnand %p2890_p11, %p2884_p3 }
  0x68   : > { %2894 = shalt.err (!%p2891_p4)
}
  0x69   : > { %2557 = dma.hbm_to_vmem [thread:$0]  (!%p3138_p9), %s3192_s13, 3072, %s293_s5, %s3155_s10, %s3003_s19, %s3003_s19, %s3004_s20  }
  0x6a   : > { %s3859_s16 = sand.u32 1, %s2993_s26   ;;  %s2523_s9 = smul.u32 48, %s2997_s27 }
  0x6b   : > { %s2522_s1 = smul.u32 3, %s3859_s16  ;;  %s3860_s22 = sand.u32 1, %s2997_s27  }
  0x6c   : > { %s3232_s14 = scalar_lea.hbm %s3823_s3, %s2523_s9  ;;  %s303_s18 = scalar_lea.sflag [#allocation11], %s3860_s22 }
  0x6d   : > { %s306_s8 = scalar_lea.vmem [#allocation10], %s2522_s1  ;;  %s2895_s21 = scalar_lea.hbm %s3232_s14, 48 }
  0x6e   : > { %s314_s30 = sshll.u32 %s306_s8, 4  ;;  %p2896_p1 = scmp.ne.s32.totalorder %s3232_s14, %s2895_s21  ;;  %s315_s30 = int_to_ptr.vmem [resolvable:$true] %s314_s30 }
  0x6f   : > { %s2900_s19 = scalar_lea.hbm %s3823_s3, 96  ;;  %p2901_p12 = scmp.lt.s32.totalorder %s3232_s14, %s3823_s3 }
  0x70   : > { %p2898_p5 = pnand %p2896_p1, %p3161_p13  ;;  %p2902_p0 = scmp.lt.s32.totalorder %s2900_s19, %s2895_s21 }
  0x72   : > { %p2899_p10 = pneg %p2898_p5  ;;  %p2903_p8 = por %p2902_p0, %p2901_p12 }
  0x74   : > { %p2904_p2 = pnand %p2903_p8, %p2899_p10 }
  0x76   : > { %2907 = shalt.err (!%p2904_p2)
}
  0x77   : > { %s2908_s16 = scalar_lea.vmem %s315_s30, 48  ;;  %s3007_s27 = smov [#allocation10]  }
  0x78   : > { %p2909_p3 = scmp.ne.s32.totalorder %s315_s30, %s2908_s16  ;;  %s2913_s1 = sshll.u32 %s3007_s27, 4  ;;  %s2914_s1 = int_to_ptr.vmem [resolvable:$false] %s2913_s1 }
  0x79   : > { %s2915_s9 = scalar_lea.vmem %s2914_s1, 96  ;;  %p2916_p11 = scmp.lt.s32.totalorder %s315_s30, %s2914_s1 }
  0x7a   : > { %p2911_p6 = pnand %p2909_p3, %p3161_p13  ;;  %p2917_p4 = scmp.lt.s32.totalorder %s2915_s9, %s2908_s16 }
  0x7c   : > { %p2912_p7 = pneg %p2911_p6  ;;  %p2918_p1 = por %p2917_p4, %p2916_p11 }
  0x7e   : > { %p2919_p5 = pnand %p2918_p1, %p2912_p7 }
  0x80   : > { %2922 = shalt.err (!%p2919_p5)
}
  0x81   : > { %2560 = dma.hbm_to_vmem [thread:$0]  (!%p3138_p9), %s3232_s14, 48, %s315_s30, %s303_s18  }
  0x82   : > { %p3861_p10 = scmp.ne.s32.totalorder %s3848_s12, 0 }
  0x84   : > { %329 = sbr.rel (%p3861_p10) target bundleno = 2500 (0x9c4), region = 48 }
  0x89   : > { %p3862_p12 = scmp.eq.s32.totalorder %s3073_s28, 0 }
  0x8b   : > { %2964 = dma.done.wait (%p3862_p12), [#allocation5], 512   ;;  %p3863_p13 = pmov %p3862_p12 }
  0x8c   : > { %s335_s17 = sand.u32 1, %s3073_s28   ;;  %s337_s23 = sand.u32 1, %s2989_s25  }
  0x8d   : > { %2966 = vsyncadd (%p3863_p13), [#allocation5], 4294966784  ;;  %s2524_s15 = smul.u32 192, %s337_s23  ;;  %s336_s8 = scalar_lea.sflag [#allocation8], %s335_s17 }
  0x8e   : > { %p3864_p0 = scmp.ne.s32.totalorder %s3847_s11, 0 }
  0x8f   : > { %s3260_s22 = scalar_lea.vmem [#allocation7], %s2524_s15 }
  0x90   : > { %2968 = dma.done.wait (%p3864_p0), %s336_s8, 6144  }
  0x91   : > { %2970 = vsyncadd (%p3864_p0), %s336_s8, 4294961152  ;;  %s3266_s12 = smul.u32 3, %s337_s23  ;;  %s3268_s24 = scalar_lea.vmem [#allocation9], %s2524_s15 }
  0x92   : > { %s354_s14 = scalar_lea.sflag [#allocation11], %s335_s17 }
  0x93   : > { %s357_s30 = scalar_lea.vmem [#allocation10], %s3266_s12 }
  0x94   : > { %2972 = dma.done.wait (%p3864_p0), %s354_s14, 48  }
  0x95   : > { %2974 = vsyncadd (%p3864_p0), %s354_s14, 4294967248  ;;  %p3865_p9 = pmov %p3862_p12 }
  0x97   : > { %2976 = dma.done.wait (%p3865_p9), [#allocation11], 1024   ;;  %p3866_p8 = pmov %p3865_p9 }
  0x98   : > { %p400_p2 = scmp.lt.s32.totalorder %s3073_s28, 1  ;;  %p3867_p3 = scmp.ne.s32.totalorder %s3073_s28, 0 }
  0x99   : > { %2978 = vsyncadd (%p3866_p8), [#allocation11], 4294966272 }
  0x9a   : > { %s3281_s18 = scalar_select %p400_p2, %s3073_s28, 1 }
  0x9b   : > { %407 = sbr.rel (%p3867_p3) target bundleno = 163 (0xa3), region = 72 }
  0x9c   : > { %s402_s10 = scalar_lea.vmem %s3824_s4, %s3281_s18 }
  0xa0   : > { %v408_v0 = vld [vmem:[#allocation4] sm:$0xff]   ;;  %v410_v1 = vld [vmem:[#allocation4 + $0x8] sm:$0xff]   ;;  %v412_v2 = vld [vmem:[#allocation4 + $0x10] sm:$0xff]  }
  0xa1   : > { %416 = vst [vmem:[#allocation3] sm:$0xff] %v408_v0   ;;  %418 = vst [vmem:[#allocation3 + $0x8] sm:$0xff] %v410_v1   ;;  %v414_v3 = vld [vmem:[#allocation4 + $0x18] sm:$0xff]  }
  0xa2   : > { %420 = vst [vmem:[#allocation3 + $0x10] sm:$0xff] %v412_v2   ;;  %422 = vst [vmem:[#allocation3 + $0x18] sm:$0xff] %v414_v3  }
  0xa3 PF: > { %v2612_v4 = vld [vmem:[%s3260_s22 + $0xac] ss:$12 sps:$4 sm:$0xff]   ;;  %v2614_v5 = vld [vmem:[%s3260_s22 + $0xa8] ss:$12 sps:$4 sm:$0xff]   ;;  %v3839_v6 = vmov 0   ;;  %v3841_v39 = vmov 0.0   ;;  %v1028_v58 = vlaneseq }
  0xa4   : > { %648 = vmatprep.mubr.bf16.mxu0 %v3839_v6  ;;  %616 = vmatprep.subr.bf16.mxu0 %v2612_v4  ;;  %v2615_v7 = vld [vmem:[%s3260_s22 + $0x94] ss:$12 sps:$4 sm:$0xff]   ;;  %v2617_v8 = vld [vmem:[%s3260_s22 + $0x90] ss:$12 sps:$4 sm:$0xff]   ;;  %v2620_v10 = vld [vmem:[%s3260_s22 + $0x78] ss:$12 sps:$4 sm:$0xff]  }
  0xa5   : > { %617 = vmatpush1.bf16.msra.mxu0 %v2614_v5  ;;  %v2618_v9 = vld [vmem:[%s3260_s22 + $0x7c] ss:$12 sps:$4 sm:$0xff]   ;;  %v2621_v11 = vld [vmem:[%s3260_s22 + $0x64] ss:$12 sps:$4 sm:$0xff]   ;;  %v2623_v13 = vld [vmem:[%s3260_s22 + $0x60] ss:$12 sps:$4 sm:$0xff]  }
  0xa6   : > { %618 = vmatprep.subr.bf16.mxu0 %v2615_v7  ;;  %v2633_v12 = vld [vmem:[%s3260_s22 + $0xb0] ss:$12 sps:$4 sm:$0xff]   ;;  %v2624_v14 = vld [vmem:[%s3260_s22 + $0x4c] ss:$12 sps:$4 sm:$0xff]   ;;  %v2626_v17 = vld [vmem:[%s3260_s22 + $0x48] ss:$12 sps:$4 sm:$0xff]  }
  0xa7   : > { %2314 = vmatprep.subr.bf16.mxu1 %v2633_v12  ;;  %v2637_v15 = vld [vmem:[%s3260_s22 + $0x98] ss:$12 sps:$4 sm:$0xff]   ;;  %v2642_v18 = vld [vmem:[%s3260_s22 + $0x80] ss:$12 sps:$4 sm:$0xff]   ;;  %v2646_v20 = vld [vmem:[%s3260_s22 + $0x68] ss:$12 sps:$4 sm:$0xff]  }
  0xa8   : > { %2315 = vmatpush3.bf16.msra.mxu1 %v2633_v12  ;;  %v2638_v16 = vld [vmem:[#allocation3] sm:$0xff]   ;;  %v2629_v21 = vld [vmem:[%s3260_s22 + $0x30] ss:$12 sps:$4 sm:$0xff]   ;;  %v3313_v28 = vld [vmem:[%s3268_s24 + $0xac] ss:$12 sps:$4 sm:$0xff]   ;;  %vm3010_vm0 = vmmov 0  }
  0xa9   : > { %619 = vmatpush1.bf16.msra.mxu0 %v2617_v8  ;;  %2316 = vmatprep.subr.bf16.mxu1 %v2637_v15  ;;  %v2627_v19 = vld [vmem:[%s3260_s22 + $0x34] ss:$12 sps:$4 sm:$0xff]   ;;  %v2630_v22 = vld [vmem:[%s3260_s22 + $0x1c] ss:$12 sps:$4 sm:$0xff]   ;;  %v2632_v24 = vld [vmem:[%s3260_s22 + $0x18] ss:$12 sps:$4 sm:$0xff]  }
  0xaa   : > { %620 = vmatprep.subr.bf16.mxu0 %v2618_v9  ;;  %2330 = vmatprep.mubr.bf16.mxu1 %v2638_v16  ;;  %v2651_v23 = vld [vmem:[%s3260_s22 + $0x50] ss:$12 sps:$4 sm:$0xff]   ;;  %v2655_v26 = vld [vmem:[%s3260_s22 + $0x38] ss:$12 sps:$4 sm:$0xff]   ;;  %v2636_v27 = vld [vmem:[%s3260_s22] ss:$12 sps:$4 sm:$0xff]  }
  0xab   : > { %v2634_v25 = vld [vmem:[%s3260_s22 + $0x4] ss:$12 sps:$4 sm:$0xff]   ;;  %v2660_v29 = vld [vmem:[%s3260_s22 + $0x20] ss:$12 sps:$4 sm:$0xff]   ;;  %v3317_v30 = vld [vmem:[%s3268_s24 + $0xa8] ss:$12 sps:$4 sm:$0xff]  }
  0xac   : > { %2317 = vmatpush3.bf16.msra.mxu1 %v2637_v15  ;;  %v3321_v31 = vld [vmem:[%s3268_s24 + $0x94] ss:$12 sps:$4 sm:$0xff]   ;;  %v3326_v33 = vld [vmem:[%s3268_s24 + $0x90] ss:$12 sps:$4 sm:$0xff]   ;;  %v2647_v35 = vld [vmem:[#allocation3 + $0x8] sm:$0xff]   ;;  %v1029_v59 = vshrl.u32 %v1028_v58, 7 }
  0xad   : > { %621 = vmatpush1.bf16.msra.mxu0 %v2620_v10  ;;  %2318 = vmatprep.subr.bf16.mxu1 %v2642_v18  ;;  %v2664_v32 = vld [vmem:[%s3260_s22 + $0x8] ss:$12 sps:$4 sm:$0xff]   ;;  %v3335_v36 = vld [vmem:[%s3268_s24 + $0x78] ss:$12 sps:$4 sm:$0xff]   ;;  %v3342_v38 = vld [vmem:[%s3268_s24 + $0xb0] ss:$12 sps:$4 sm:$0xff]  }
  0xae   : > { %622 = vmatprep.subr.bf16.mxu0 %v2621_v11  ;;  %v3331_v34 = vld [vmem:[%s3268_s24 + $0x7c] ss:$12 sps:$4 sm:$0xff]   ;;  %v3339_v37 = vld [vmem:[%s3268_s24 + $0x64] ss:$12 sps:$4 sm:$0xff]   ;;  %v3347_v40 = vld [vmem:[%s3268_s24 + $0x60] ss:$12 sps:$4 sm:$0xff]  }
  0xaf   : > { %v2656_v41 = vld [vmem:[#allocation3 + $0x10] sm:$0xff]   ;;  %v3352_v42 = vld [vmem:[%s3268_s24 + $0x4c] ss:$12 sps:$4 sm:$0xff]   ;;  %v3379_v49 = vld [vmem:[%s3268_s24 + $0x1c] ss:$12 sps:$4 sm:$0xff]   ;;  %v1030_v60 = vsub.s32 0, %v1029_v59 }
  0xb0   : > { %2319 = vmatpush3.bf16.msra.mxu1 %v2642_v18  ;;  %v3356_v43 = vld [vmem:[%s3268_s24 + $0x98] ss:$12 sps:$4 sm:$0xff]   ;;  %v3361_v44 = vld [vmem:[%s3268_s24 + $0x48] ss:$12 sps:$4 sm:$0xff]   ;;  %v3369_v46 = vld [vmem:[%s3268_s24 + $0x80] ss:$12 sps:$4 sm:$0xff]  }
  0xb1   : > { %623 = vmatpush1.bf16.msra.mxu0 %v2623_v13  ;;  %2320 = vmatprep.subr.bf16.mxu1 %v2646_v20  ;;  %v3365_v45 = vld [vmem:[%s3268_s24 + $0x34] ss:$12 sps:$4 sm:$0xff]   ;;  %v2665_v47 = vld [vmem:[#allocation3 + $0x18] sm:$0xff]   ;;  %v3394_v52 = vld [vmem:[%s3268_s24 + $0x4] ss:$12 sps:$4 sm:$0xff]   ;;  %v1034_v63 = vsub.s32 1, %v1029_v59 }
  0xb2   : > { %624 = vmatprep.subr.bf16.mxu0 %v2624_v14  ;;  %v3374_v48 = vld [vmem:[%s3268_s24 + $0x30] ss:$12 sps:$4 sm:$0xff]   ;;  %v3383_v50 = vld [vmem:[%s3268_s24 + $0x68] ss:$12 sps:$4 sm:$0xff]   ;;  %v3390_v51 = vld [vmem:[%s3268_s24 + $0x18] ss:$12 sps:$4 sm:$0xff]  }
  0xb3   : > { %v3398_v53 = vld [vmem:[%s3268_s24 + $0x50] ss:$12 sps:$4 sm:$0xff]   ;;  %v3403_v54 = vld [vmem:[%s3268_s24] ss:$12 sps:$4 sm:$0xff]   ;;  %v3409_v55 = vld [vmem:[%s3268_s24 + $0x38] ss:$12 sps:$4 sm:$0xff]  }
  0xb4   : > { %2321 = vmatpush3.bf16.msra.mxu1 %v2646_v20  ;;  %v3416_v56 = vld [vmem:[%s3268_s24 + $0x20] ss:$12 sps:$4 sm:$0xff]   ;;  %v3425_v57 = vld [vmem:[%s3268_s24 + $0x8] ss:$12 sps:$4 sm:$0xff]   ;;  %v1038_v2 = vsub.s32 2, %v1029_v59  ;;  %p2207_p6 = scmp.ne.s32.totalorder %s3073_s28, 1 }
  0xb5   : > { %625 = vmatpush1.bf16.msra.mxu0 %v2626_v17  ;;  %2322 = vmatprep.subr.bf16.mxu1 %v2651_v23  ;;  %v810_v62 = vld [vmem:[%s357_s30] sm:$0x7] }
  0xb6   : > { %626 = vmatprep.subr.bf16.mxu0 %v2627_v19  ;;  %v1031_v1 = vrot.slane %v810_v62, %v1030_v60  ;;  %v1035_v4 = vrot.slane %v810_v62, %v1034_v63  ;;  %v3469_v9 = vrot.slane %v810_v62, %v1038_v2 }
  0xb8   : > { %2323 = vmatpush3.bf16.msra.mxu1 %v2651_v23 }
  0xb9   : > { %627 = vmatpush1.bf16.msra.mxu0 %v2629_v21  ;;  %2324 = vmatprep.subr.bf16.mxu1 %v2655_v26 }
  0xba   : > { %628 = vmatprep.subr.bf16.mxu0 %v2630_v22 }
  0xbc   : > { %2325 = vmatpush3.bf16.msra.mxu1 %v2655_v26 }
  0xbd   : > { %629 = vmatpush1.bf16.msra.mxu0 %v2632_v24  ;;  %2326 = vmatprep.subr.bf16.mxu1 %v2660_v29 }
  0xbe   : > { %630 = vmatprep.subr.bf16.mxu0 %v2634_v25 }
  0xc0   : > { %2327 = vmatpush3.bf16.msra.mxu1 %v2660_v29 }
  0xc1   : > { %631 = vmatpush1.bf16.msra.mxu0 %v2636_v27  ;;  %2328 = vmatprep.subr.bf16.mxu1 %v2664_v32 }
  0xc2   : > { %940 = vmatprep.subr.bf16.mxu0 %v3313_v28 }
  0xc4   : > { %649 = vmatmul.mubr.bf16.vlgmr.msra.gmra.mxu0 %v2638_v16  ;;  %2329 = vmatpush3.bf16.msra.mxu1 %v2664_v32 }
  0xc5   : > { %941 = vmatpush1.bf16.msra.mxu0 %v3317_v30  ;;  %658 = vmatprep.mubr.bf16.mxu0 %v3839_v6 }
  0xc6   : > { %942 = vmatprep.subr.bf16.mxu0 %v3321_v31  ;;  %2338 = vmatprep.subr.bf16.mxu1 %v3841_v39 }
  0xc7   : > { %2331 = vmatmul.mubr.bf16.vlgmr.msra.gmra.mxu1 %v2647_v35 }
  0xc8   : > { %2339 = vmatpush3.bf16.msra.mxu1 %v3342_v38  ;;  %2334 = vmatprep.mubr.bf16.mxu1 %v2656_v41 }
  0xc9   : > { %943 = vmatpush1.bf16.msra.mxu0 %v3326_v33  ;;  %2340 = vmatprep.subr.bf16.mxu1 %v3841_v39 }
  0xca   : > { %944 = vmatprep.subr.bf16.mxu0 %v3331_v34 }
  0xcc   : > { %659 = vmatmul.mubr.bf16.gmra.mxu0 %v2647_v35  ;;  %2341 = vmatpush3.bf16.msra.mxu1 %v3356_v43 }
  0xcd   : > { %945 = vmatpush1.bf16.msra.mxu0 %v3335_v36  ;;  %668 = vmatprep.mubr.bf16.mxu0 %v3839_v6 }
  0xce   : > { %946 = vmatprep.subr.bf16.mxu0 %v3339_v37  ;;  %2342 = vmatprep.subr.bf16.mxu1 %v3841_v39 }
  0xcf   : > { %2335 = vmatmul.mubr.bf16.gmra.mxu1 %v2665_v47 }
  0xd0   : > { %2343 = vmatpush3.bf16.msra.mxu1 %v3369_v46  ;;  %2354 = vmatprep.mubr.msk.bf16.mxu1 %vm3010_vm0, %v3841_v39 }
  0xd1   : > { %947 = vmatpush1.bf16.msra.mxu0 %v3347_v40  ;;  %2344 = vmatprep.subr.bf16.mxu1 %v3841_v39 }
  0xd2   : > { %948 = vmatprep.subr.bf16.mxu0 %v3352_v42 }
  0xd4   : > { %669 = vmatmul.mubr.bf16.gmra.mxu0 %v2656_v41  ;;  %2345 = vmatpush3.bf16.msra.mxu1 %v3383_v50 }
  0xd5   : > { %949 = vmatpush1.bf16.msra.mxu0 %v3361_v44  ;;  %678 = vmatprep.mubr.bf16.mxu0 %v3839_v6 }
  0xd6   : > { %950 = vmatprep.subr.bf16.mxu0 %v3365_v45  ;;  %2346 = vmatprep.subr.bf16.mxu1 %v3841_v39 }
  0xd8   : > { %2347 = vmatpush3.bf16.msra.mxu1 %v3398_v53 }
  0xd9   : > { %951 = vmatpush1.bf16.msra.mxu0 %v3374_v48  ;;  %2348 = vmatprep.subr.bf16.mxu1 %v3841_v39 }
  0xda   : > { %952 = vmatprep.subr.bf16.mxu0 %v3379_v49 }
  0xdc   : > { %679 = vmatmul.mubr.bf16.gmra.mxu0 %v2665_v47  ;;  %2349 = vmatpush3.bf16.msra.mxu1 %v3409_v55 }
  0xdd   : > { %953 = vmatpush1.bf16.msra.mxu0 %v3390_v51  ;;  %972 = vmatprep.mubr.bf16.mxu0 %v3839_v6 }
  0xde   : > { %954 = vmatprep.subr.bf16.mxu0 %v3394_v52  ;;  %2350 = vmatprep.subr.bf16.mxu1 %v3841_v39 }
  0xe0   : > { %2351 = vmatpush3.bf16.msra.mxu1 %v3416_v56 }
  0xe1   : > { %955 = vmatpush1.bf16.msra.mxu0 %v3403_v54  ;;  %2352 = vmatprep.subr.bf16.mxu1 %v3841_v39 }
  0xe2   : > { %1075 = vmatprep.subr.bf16.mxu0 %v3313_v28 }
  0xe4   : > { %973 = vmatmul.mubr.bf16.vlgmr.msra.gmra.mxu0 %v3839_v6  ;;  %2353 = vmatpush3.bf16.msra.mxu1 %v3425_v57 }
  0xe5   : > { %1076 = vmatpush1.bf16.msra.mxu0 %v3317_v30  ;;  %1107 = vmatprep.mubr.bf16.mxu0 %v3839_v6 }
  0xe6   : > { %1077 = vmatprep.subr.bf16.mxu0 %v3321_v31  ;;  %2358 = vmatprep.subr.bf16.mxu1 %v3841_v39 }
  0xe7   : > { %2355 = vmatmul.mubr.bf16.vlgmr.msra.gmra.mxu1 %v3839_v6 }
  0xe8   : > { %2359 = vmatpush3.bf16.msra.mxu1 %v3342_v38  ;;  %2374 = vmatprep.mubr.msk.bf16.mxu1 %vm3010_vm0, %v3841_v39 }
  0xe9   : > { %1078 = vmatpush1.bf16.msra.mxu0 %v3326_v33  ;;  %2360 = vmatprep.subr.bf16.mxu1 %v3841_v39 }
  0xea   : > { %1079 = vmatprep.subr.bf16.mxu0 %v3331_v34 }
  0xec   : > { %2361 = vmatpush3.bf16.msra.mxu1 %v3356_v43 }
  0xed   : > { %1080 = vmatpush1.bf16.msra.mxu0 %v3335_v36  ;;  %2362 = vmatprep.subr.bf16.mxu1 %v3841_v39 }
  0xee   : > { %1081 = vmatprep.subr.bf16.mxu0 %v3339_v37 }
  0xf0   : > { %2363 = vmatpush3.bf16.msra.mxu1 %v3369_v46 }
  0xf1   : > { %1082 = vmatpush1.bf16.msra.mxu0 %v3347_v40  ;;  %2364 = vmatprep.subr.bf16.mxu1 %v3841_v39 }
  0xf2   : > { %1083 = vmatprep.subr.bf16.mxu0 %v3352_v42 }
  0xf4   : > { %2365 = vmatpush3.bf16.msra.mxu1 %v3383_v50 }
  0xf5   : > { %1084 = vmatpush1.bf16.msra.mxu0 %v3361_v44  ;;  %2366 = vmatprep.subr.bf16.mxu1 %v3841_v39 }
  0xf6   : > { %1085 = vmatprep.subr.bf16.mxu0 %v3365_v45 }
  0xf8   : > { %2367 = vmatpush3.bf16.msra.mxu1 %v3398_v53 }
  0xf9   : > { %1086 = vmatpush1.bf16.msra.mxu0 %v3374_v48  ;;  %2368 = vmatprep.subr.bf16.mxu1 %v3841_v39 }
  0xfa   : > { %1087 = vmatprep.subr.bf16.mxu0 %v3379_v49 }
  0xfc   : > { %2369 = vmatpush3.bf16.msra.mxu1 %v3409_v55 }
  0xfd   : > { %1088 = vmatpush1.bf16.msra.mxu0 %v3390_v51  ;;  %2370 = vmatprep.subr.bf16.mxu1 %v3841_v39 }
  0xfe   : > { %1089 = vmatprep.subr.bf16.mxu0 %v3394_v52 }
 0x100   : > { %2371 = vmatpush3.bf16.msra.mxu1 %v3416_v56 }
 0x101   : > { %1090 = vmatpush1.bf16.msra.mxu0 %v3403_v54  ;;  %2372 = vmatprep.subr.bf16.mxu1 %v3841_v39 }
 0x102   : > { %1189 = vmatprep.subr.bf16.mxu0 %v3313_v28 }
 0x104   : > { %2373 = vmatpush3.bf16.msra.mxu1 %v3425_v57 }
 0x105   : > { %2378 = vmatprep.subr.bf16.mxu1 %v3841_v39 }
 0x184   : > { %v650_v61 = vpop.f32.mrf.mxu0 }
 0x186   : > { %v652_v0 = vpop.f32.mrf.mxu0 }
 0x187   : > { %v2332_v13 = vpop.f32.mrf.mxu1 }
 0x188   : > { %v654_v3 = vpop.f32.mrf.mxu0  ;;  %v3476_v15 = vadd.f32 %v2332_v13, %v3469_v9 }
 0x189   : > { %v3465_v5 = vadd.f32 %v1031_v1, %v654_v3  ;;  %v723_v17 = vpop.f32.mrf.mxu1 }
 0x18a   : > { %v656_v7 = vpop.f32.mrf.mxu0 }
 0x18b   : > { %v3467_v8 = vadd.f32 %v1035_v4, %v656_v7  ;;  %v2333_v20 = vpop.f32.mrf.mxu1 }
 0x18c   : > { %v660_v10 = vpop.f32.mrf.mxu0  ;;  %v3483_v22 = vadd.f32 %v2333_v20, %v3469_v9 }
 0x18d   : > { %v3471_v11 = vadd.f32 %v1031_v1, %v660_v10  ;;  %v726_v24 = vpop.f32.mrf.mxu1 }
 0x18e   : > { %v662_v12 = vpop.f32.mrf.mxu0  ;;  %v3488_v26 = vadd.f32 %v3469_v9, %v726_v24  ;;  %v1043_v24 = vadd.f32 %v1031_v1, %v650_v61  ;;  %v3521_v61 = vld [vmem:[%s402_s10] ss:$0 sm:$0xff] }
 0x18f   : > { %v3473_v14 = vadd.f32 %v1035_v4, %v662_v12  ;;  %v2336_v29 = vpop.f32.mrf.mxu1 }
 0x190   : > { %v664_v16 = vpop.f32.mrf.mxu0  ;;  %v3493_v35 = vadd.f32 %v2336_v29, %v3469_v9 }
 0x191   : > { %v3478_v18 = vadd.f32 %v1031_v1, %v664_v16  ;;  %v739_v47 = vpop.f32.mrf.mxu1 }
 0x192   : > { %v666_v19 = vpop.f32.mrf.mxu0  ;;  %3868 = vst [vmem:[#allocation20_spill] sm:$0xff] %v3493_v35  ;;  %v3498_v59 = vadd.f32 %v3469_v9, %v739_v47 }
 0x193   : > { %v3480_v21 = vadd.f32 %v1035_v4, %v666_v19  ;;  %v2337_v62 = vpop.f32.mrf.mxu1 }
 0x194   : > { %v670_v23 = vpop.f32.mrf.mxu0  ;;  %v3503_v2 = vadd.f32 %v2337_v62, %v3469_v9 }
 0x195   : > { %v3485_v25 = vadd.f32 %v1031_v1, %v670_v23  ;;  %v742_v7 = vpop.f32.mrf.mxu1 }
 0x196   : > { %v672_v27 = vpop.f32.mrf.mxu0  ;;  %3869 = vst [vmem:[#allocation21_spill] sm:$0xff] %v3503_v2  ;;  %v3508_v12 = vadd.f32 %v3469_v9, %v742_v7  ;;  %v1044_v7 = vadd.f32 %v1035_v4, %v652_v0 }
 0x197   : > { %v3490_v32 = vadd.f32 %v1035_v4, %v672_v27 }
 0x198   : > { %v674_v41 = vpop.f32.mrf.mxu0 }
 0x199   : > { %v3495_v58 = vadd.f32 %v1031_v1, %v674_v41 }
 0x19a   : > { %v676_v60 = vpop.f32.mrf.mxu0 }
 0x19b   : > { %v3500_v63 = vadd.f32 %v1035_v4, %v676_v60 }
 0x19c   : > { %v680_v3 = vpop.f32.mrf.mxu0 }
 0x19d   : > { %v3505_v10 = vadd.f32 %v1031_v1, %v680_v3 }
 0x19e   : > { %v682_v13 = vpop.f32.mrf.mxu0 }
 0x19f   : > { %v3510_v16 = vadd.f32 %v1035_v4, %v682_v13 }
 0x1a0   : > { %v684_v19 = vpop.f32.mrf.mxu0 }
 0x1a1   : > { %3870 = vst [vmem:[#allocation22_spill] sm:$0xff] %v3510_v16  ;;  %v3512_v20 = vadd.f32 %v1031_v1, %v684_v19 }
 0x1a2   : > { %v686_v23 = vpop.f32.mrf.mxu0 }
 0x1a3   : > { %3871 = vst [vmem:[#allocation23_spill] sm:$0xff] %v3512_v20  ;;  %v3514_v27 = vadd.f32 %v1035_v4, %v686_v23  ;;  %v1045_v4 = vadd.f32 %v3469_v9, %v723_v17  ;;  %v3873_v9 = vmov 0  }
 0x1a4   : > { %v974_v29 = vpop.f32.mrf.mxu0 }
 0x1a5   : > { %v1046_v41 = vadd.f32 %v1043_v24, %v974_v29 }
 0x1a6   : > { %v976_v47 = vpop.f32.mrf.mxu0 }
 0x1a7   : > { %v2190_v60 = vmul.f32 -1.442695, %v1046_v41  ;;  %v1015_v6 = vpop.f32.mrf.mxu1  ;;  %v1053_v39 = vadd.f32 %v1044_v7, %v976_v47 }
 0x1a8   : > { %v978_v62 = vpop.f32.mrf.mxu0  ;;  %v1066_v1 = vadd.f32 %v3521_v61, %v1015_v6  ;;  %v3872_v6 = vmov 0.0  }
 0x1a9   : > { %2680 = vpow2.f32 %v2190_v60  ;;  %v2356_v13 = vpop.f32.mrf.mxu1  ;;  %v2191_v35 = vmul.f32 -1.442695, %v1053_v39 }
 0x1aa   : > { %v979_v3 = vpop.f32.mrf.mxu0 }
 0x1ab   : > { %v1018_v2 = vpop.f32.mrf.mxu1  ;;  %2682 = vpow2.f32 %v2191_v35 }
 0x1ad   : > { %v2357_v19 = vpop.f32.mrf.mxu1 }
 0x1b6   : > { %v2681_v20 = vpop.eup %2680 }
 0x1b7   : > { %v1050_v16 = vadd.f32 1.0, %v2681_v20 }
 0x1b8   : > { %v2683_v23 = vpop.eup %2682 }
 0x1b9   : > { %2684 = vrcp.f32 %v1050_v16  ;;  %v1057_v2 = vadd.f32 1.0, %v2683_v23 }
 0x1c6   : > { %v2685_v0 = vpop.eup %2684 }
 0x1c7   : > { %v1067_v24 = vmul.f32 %v2685_v0, %v1066_v1 }
 0x1c9   : > { %v1068_v39 = vadd.f32 %v1067_v24, %v1045_v4 }
 0x1cb   : > { %2686 = vtanh.f32 %v1068_v39 }
 0x1cc   : > { %2688 = vrcp.f32 %v1057_v2 }
 0x1d8   : > { %v2687_v20 = vpop.eup %2686 }
 0x1d9   : > { %v1070_v35 = vsub.f32 0.0, %v2687_v20  ;;  %v2689_v16 = vpop.eup %2688 }
 0x1db   : > { %v1071_v29 = vmul.f32 %v2689_v16, %v1070_v35 }
 0x1dd   : > { %v3525_v41 = vadd.f32 %v2687_v20, %v1071_v29 }
 0x1df   : > { %v1073_v47 = vpack.c.bf16 %v3525_v41, %v3525_v41 }
 0x1e1   : > { %1074 = vst [vmem:[#allocation3] sm:$0xf] %v1073_v47  ;;  %1108 = vmatmul.mubr.bf16.vlgmr.msra.gmra.mxu0 %v1073_v47  ;;  %2375 = vmatmul.mubr.bf16.vlgmr.msra.gmra.mxu1 %v1073_v47 }
 0x1e2   : > { %1190 = vmatpush1.bf16.msra.mxu0 %v3317_v30  ;;  %2379 = vmatpush3.bf16.msra.mxu1 %v3342_v38 }
 0x1e3   : > { %1191 = vmatprep.subr.bf16.mxu0 %v3321_v31  ;;  %2380 = vmatprep.subr.bf16.mxu1 %v3872_v6 }
 0x1e4   : > { %1221 = vmatprep.mubr.bf16.mxu0 %v3873_v9  ;;  %2394 = vmatprep.mubr.msk.bf16.mxu1 %vm3010_vm0, %v3872_v6 }
 0x1e6   : > { %1192 = vmatpush1.bf16.msra.mxu0 %v3326_v33  ;;  %2381 = vmatpush3.bf16.msra.mxu1 %v3356_v43 }
 0x1e7   : > { %1193 = vmatprep.subr.bf16.mxu0 %v3331_v34  ;;  %2382 = vmatprep.subr.bf16.mxu1 %v3872_v6 }
 0x1ea   : > { %1194 = vmatpush1.bf16.msra.mxu0 %v3335_v36  ;;  %2383 = vmatpush3.bf16.msra.mxu1 %v3369_v46 }
 0x1eb   : > { %1195 = vmatprep.subr.bf16.mxu0 %v3339_v37  ;;  %2384 = vmatprep.subr.bf16.mxu1 %v3872_v6 }
 0x1ee   : > { %1196 = vmatpush1.bf16.msra.mxu0 %v3347_v40  ;;  %2385 = vmatpush3.bf16.msra.mxu1 %v3383_v50 }
 0x1ef   : > { %1197 = vmatprep.subr.bf16.mxu0 %v3352_v42  ;;  %2386 = vmatprep.subr.bf16.mxu1 %v3872_v6 }
 0x1f2   : > { %1198 = vmatpush1.bf16.msra.mxu0 %v3361_v44  ;;  %2387 = vmatpush3.bf16.msra.mxu1 %v3398_v53 }
 0x1f3   : > { %1199 = vmatprep.subr.bf16.mxu0 %v3365_v45  ;;  %2388 = vmatprep.subr.bf16.mxu1 %v3872_v6 }
 0x1f6   : > { %1200 = vmatpush1.bf16.msra.mxu0 %v3374_v48  ;;  %2389 = vmatpush3.bf16.msra.mxu1 %v3409_v55 }
 0x1f7   : > { %1201 = vmatprep.subr.bf16.mxu0 %v3379_v49  ;;  %2390 = vmatprep.subr.bf16.mxu1 %v3872_v6 }
 0x1fa   : > { %1202 = vmatpush1.bf16.msra.mxu0 %v3390_v51  ;;  %2391 = vmatpush3.bf16.msra.mxu1 %v3416_v56 }
 0x1fb   : > { %1203 = vmatprep.subr.bf16.mxu0 %v3394_v52  ;;  %2392 = vmatprep.subr.bf16.mxu1 %v3872_v6 }
 0x1fe   : > { %1204 = vmatpush1.bf16.msra.mxu0 %v3403_v54  ;;  %2393 = vmatpush3.bf16.msra.mxu1 %v3425_v57 }
 0x1ff   : > { %1303 = vmatprep.subr.bf16.mxu0 %v3313_v28  ;;  %2398 = vmatprep.subr.bf16.mxu1 %v3872_v6 }
 0x2a1   : > { %v1109_v17 = vpop.f32.mrf.mxu0  ;;  %v1150_v60 = vpop.f32.mrf.mxu1 }
 0x2a2   : > { %v1165_v62 = vadd.f32 %v3465_v5, %v1109_v17  ;;  %v1179_v35 = vadd.f32 %v3521_v61, %v1150_v60 }
 0x2a3   : > { %v1111_v3 = vpop.f32.mrf.mxu0  ;;  %v2376_v7 = vpop.f32.mrf.mxu1 }
 0x2a4   : > { %v2193_v13 = vmul.f32 -1.442695, %v1165_v62  ;;  %v1172_v4 = vadd.f32 %v3467_v8, %v1111_v3 }
 0x2a5   : > { %v1113_v19 = vpop.f32.mrf.mxu0  ;;  %v1153_v1 = vpop.f32.mrf.mxu1 }
 0x2a6   : > { %2690 = vpow2.f32 %v2193_v13  ;;  %v2194_v24 = vmul.f32 -1.442695, %v1172_v4 }
 0x2a7   : > { %v1114_v23 = vpop.f32.mrf.mxu0  ;;  %v2377_v0 = vpop.f32.mrf.mxu1 }
 0x2a8   : > { %2692 = vpow2.f32 %v2194_v24 }
 0x2b3   : > { %v2691_v2 = vpop.eup %2690 }
 0x2b4   : > { %v1169_v39 = vadd.f32 1.0, %v2691_v2 }
 0x2b5   : > { %v2693_v20 = vpop.eup %2692 }
 0x2b6   : > { %2694 = vrcp.f32 %v1169_v39  ;;  %v1176_v47 = vadd.f32 1.0, %v2693_v20 }
 0x2c3   : > { %v2695_v16 = vpop.eup %2694 }
 0x2c4   : > { %v1180_v5 = vmul.f32 %v2695_v16, %v1179_v35 }
 0x2c6   : > { %v1181_v29 = vadd.f32 %v1180_v5, %v3488_v26 }
 0x2c8   : > { %2696 = vtanh.f32 %v1181_v29 }
 0x2c9   : > { %2698 = vrcp.f32 %v1176_v47 }
 0x2d5   : > { %v2697_v17 = vpop.eup %2696 }
 0x2d6   : > { %v1183_v62 = vsub.f32 %v3525_v41, %v2697_v17  ;;  %v2699_v7 = vpop.eup %2698 }
 0x2d8   : > { %v1184_v8 = vmul.f32 %v2699_v7, %v1183_v62 }
 0x2da   : > { %v3569_v3 = vadd.f32 %v2697_v17, %v1184_v8 }
 0x2dc   : > { %v1186_v13 = vpack.c.bf16 %v3569_v3, %v3569_v3 }
 0x2de   : > { %1188 = vst [vmem:[#allocation3 + $0x4] sm:$0xf] %v1186_v13  ;;  %1222 = vmatmul.mubr.bf16.vlgmr.msra.gmra.mxu0 %v1186_v13  ;;  %2395 = vmatmul.mubr.bf16.vlgmr.msra.gmra.mxu1 %v1186_v13 }
 0x2df   : > { %1304 = vmatpush1.bf16.msra.mxu0 %v3317_v30  ;;  %2399 = vmatpush3.bf16.msra.mxu1 %v3342_v38 }
 0x2e0   : > { %1305 = vmatprep.subr.bf16.mxu0 %v3321_v31  ;;  %2400 = vmatprep.subr.bf16.mxu1 %v3872_v6 }
 0x2e1   : > { %1335 = vmatprep.mubr.bf16.mxu0 %v3873_v9  ;;  %2414 = vmatprep.mubr.msk.bf16.mxu1 %vm3010_vm0, %v3872_v6 }
 0x2e3   : > { %1306 = vmatpush1.bf16.msra.mxu0 %v3326_v33  ;;  %2401 = vmatpush3.bf16.msra.mxu1 %v3356_v43 }
 0x2e4   : > { %1307 = vmatprep.subr.bf16.mxu0 %v3331_v34  ;;  %2402 = vmatprep.subr.bf16.mxu1 %v3872_v6 }
 0x2e7   : > { %1308 = vmatpush1.bf16.msra.mxu0 %v3335_v36  ;;  %2403 = vmatpush3.bf16.msra.mxu1 %v3369_v46 }
 0x2e8   : > { %1309 = vmatprep.subr.bf16.mxu0 %v3339_v37  ;;  %2404 = vmatprep.subr.bf16.mxu1 %v3872_v6 }
 0x2eb   : > { %1310 = vmatpush1.bf16.msra.mxu0 %v3347_v40  ;;  %2405 = vmatpush3.bf16.msra.mxu1 %v3383_v50 }
 0x2ec   : > { %1311 = vmatprep.subr.bf16.mxu0 %v3352_v42  ;;  %2406 = vmatprep.subr.bf16.mxu1 %v3872_v6 }
 0x2ef   : > { %1312 = vmatpush1.bf16.msra.mxu0 %v3361_v44  ;;  %2407 = vmatpush3.bf16.msra.mxu1 %v3398_v53 }
 0x2f0   : > { %1313 = vmatprep.subr.bf16.mxu0 %v3365_v45  ;;  %2408 = vmatprep.subr.bf16.mxu1 %v3872_v6 }
 0x2f3   : > { %1314 = vmatpush1.bf16.msra.mxu0 %v3374_v48  ;;  %2409 = vmatpush3.bf16.msra.mxu1 %v3409_v55 }
 0x2f4   : > { %1315 = vmatprep.subr.bf16.mxu0 %v3379_v49  ;;  %2410 = vmatprep.subr.bf16.mxu1 %v3872_v6 }
 0x2f7   : > { %1316 = vmatpush1.bf16.msra.mxu0 %v3390_v51  ;;  %2411 = vmatpush3.bf16.msra.mxu1 %v3416_v56 }
 0x2f8   : > { %1317 = vmatprep.subr.bf16.mxu0 %v3394_v52  ;;  %2412 = vmatprep.subr.bf16.mxu1 %v3872_v6 }
 0x2fb   : > { %1318 = vmatpush1.bf16.msra.mxu0 %v3403_v54  ;;  %2413 = vmatpush3.bf16.msra.mxu1 %v3425_v57 }
 0x2fc   : > { %1417 = vmatprep.subr.bf16.mxu0 %v3313_v28  ;;  %2418 = vmatprep.subr.bf16.mxu1 %v3872_v6 }
 0x39e   : > { %v1223_v26 = vpop.f32.mrf.mxu0  ;;  %v1264_v41 = vpop.f32.mrf.mxu1 }
 0x39f   : > { %v1279_v60 = vadd.f32 %v3471_v11, %v1223_v26  ;;  %v1293_v29 = vadd.f32 %v3521_v61, %v1264_v41 }
 0x3a0   : > { %v1225_v19 = vpop.f32.mrf.mxu0  ;;  %v2396_v1 = vpop.f32.mrf.mxu1 }
 0x3a1   : > { %v2195_v23 = vmul.f32 -1.442695, %v1279_v60  ;;  %v1286_v39 = vadd.f32 %v3473_v14, %v1225_v19 }
 0x3a2   : > { %v1227_v0 = vpop.f32.mrf.mxu0  ;;  %v1267_v4 = vpop.f32.mrf.mxu1 }
 0x3a3   : > { %2700 = vpow2.f32 %v2195_v23  ;;  %v2196_v20 = vmul.f32 -1.442695, %v1286_v39 }
 0x3a4   : > { %v1228_v24 = vpop.f32.mrf.mxu0  ;;  %v2397_v2 = vpop.f32.mrf.mxu1 }
 0x3a5   : > { %2702 = vpow2.f32 %v2196_v20 }
 0x3b0   : > { %v2701_v35 = vpop.eup %2700 }
 0x3b1   : > { %v1283_v16 = vadd.f32 1.0, %v2701_v35 }
 0x3b2   : > { %v2703_v5 = vpop.eup %2702 }
 0x3b3   : > { %2704 = vrcp.f32 %v1283_v16  ;;  %v1290_v62 = vadd.f32 1.0, %v2703_v5 }
 0x3c0   : > { %v2705_v47 = vpop.eup %2704 }
 0x3c1   : > { %v1294_v11 = vmul.f32 %v2705_v47, %v1293_v29 }
 0x3c3   : > { %v1295_v17 = vadd.f32 %v1294_v11, %v3476_v15 }
 0x3c5   : > { %2706 = vtanh.f32 %v1295_v17 }
 0x3c6   : > { %2708 = vrcp.f32 %v1290_v62 }
 0x3d2   : > { %v2707_v7 = vpop.eup %2706 }
 0x3d3   : > { %v1297_v8 = vsub.f32 %v3569_v3, %v2707_v7  ;;  %v2709_v13 = vpop.eup %2708 }
 0x3d5   : > { %v1298_v14 = vmul.f32 %v2709_v13, %v1297_v8 }
 0x3d7   : > { %v3613_v26 = vadd.f32 %v2707_v7, %v1298_v14 }
 0x3d9   : > { %v1300_v60 = vpack.c.bf16 %v3613_v26, %v3613_v26 }
 0x3db   : > { %1302 = vst [vmem:[#allocation3 + $0x8] sm:$0xf] %v1300_v60  ;;  %1336 = vmatmul.mubr.bf16.vlgmr.msra.gmra.mxu0 %v1300_v60  ;;  %2415 = vmatmul.mubr.bf16.vlgmr.msra.gmra.mxu1 %v1300_v60 }
 0x3dc   : > { %1418 = vmatpush1.bf16.msra.mxu0 %v3317_v30  ;;  %2419 = vmatpush3.bf16.msra.mxu1 %v3342_v38 }
 0x3dd   : > { %1419 = vmatprep.subr.bf16.mxu0 %v3321_v31  ;;  %2420 = vmatprep.subr.bf16.mxu1 %v3872_v6 }
 0x3de   : > { %1449 = vmatprep.mubr.bf16.mxu0 %v3873_v9  ;;  %2434 = vmatprep.mubr.msk.bf16.mxu1 %vm3010_vm0, %v3872_v6 }
 0x3e0   : > { %1420 = vmatpush1.bf16.msra.mxu0 %v3326_v33  ;;  %2421 = vmatpush3.bf16.msra.mxu1 %v3356_v43 }
 0x3e1   : > { %1421 = vmatprep.subr.bf16.mxu0 %v3331_v34  ;;  %2422 = vmatprep.subr.bf16.mxu1 %v3872_v6 }
 0x3e4   : > { %1422 = vmatpush1.bf16.msra.mxu0 %v3335_v36  ;;  %2423 = vmatpush3.bf16.msra.mxu1 %v3369_v46 }
 0x3e5   : > { %1423 = vmatprep.subr.bf16.mxu0 %v3339_v37  ;;  %2424 = vmatprep.subr.bf16.mxu1 %v3872_v6 }
 0x3e8   : > { %1424 = vmatpush1.bf16.msra.mxu0 %v3347_v40  ;;  %2425 = vmatpush3.bf16.msra.mxu1 %v3383_v50 }
 0x3e9   : > { %1425 = vmatprep.subr.bf16.mxu0 %v3352_v42  ;;  %2426 = vmatprep.subr.bf16.mxu1 %v3872_v6 }
 0x3ec   : > { %1426 = vmatpush1.bf16.msra.mxu0 %v3361_v44  ;;  %2427 = vmatpush3.bf16.msra.mxu1 %v3398_v53 }
 0x3ed   : > { %1427 = vmatprep.subr.bf16.mxu0 %v3365_v45  ;;  %2428 = vmatprep.subr.bf16.mxu1 %v3872_v6 }
 0x3f0   : > { %1428 = vmatpush1.bf16.msra.mxu0 %v3374_v48  ;;  %2429 = vmatpush3.bf16.msra.mxu1 %v3409_v55 }
 0x3f1   : > { %1429 = vmatprep.subr.bf16.mxu0 %v3379_v49  ;;  %2430 = vmatprep.subr.bf16.mxu1 %v3872_v6 }
 0x3f4   : > { %1430 = vmatpush1.bf16.msra.mxu0 %v3390_v51  ;;  %2431 = vmatpush3.bf16.msra.mxu1 %v3416_v56 }
 0x3f5   : > { %1431 = vmatprep.subr.bf16.mxu0 %v3394_v52  ;;  %2432 = vmatprep.subr.bf16.mxu1 %v3872_v6 }
 0x3f8   : > { %1432 = vmatpush1.bf16.msra.mxu0 %v3403_v54  ;;  %2433 = vmatpush3.bf16.msra.mxu1 %v3425_v57 }
 0x3f9   : > { %1531 = vmatprep.subr.bf16.mxu0 %v3313_v28  ;;  %2438 = vmatprep.subr.bf16.mxu1 %v3872_v6 }
 0x49b   : > { %v1337_v15 = vpop.f32.mrf.mxu0  ;;  %v1378_v3 = vpop.f32.mrf.mxu1 }
 0x49c   : > { %v1393_v41 = vadd.f32 %v3478_v18, %v1337_v15  ;;  %v1407_v29 = vadd.f32 %v3521_v61, %v1378_v3 }
 0x49d   : > { %v1339_v19 = vpop.f32.mrf.mxu0  ;;  %v2416_v1 = vpop.f32.mrf.mxu1 }
 0x49e   : > { %v2197_v23 = vmul.f32 -1.442695, %v1393_v41  ;;  %v1400_v39 = vadd.f32 %v3480_v21, %v1339_v19 }
 0x49f   : > { %v1341_v0 = vpop.f32.mrf.mxu0  ;;  %v1381_v4 = vpop.f32.mrf.mxu1 }
 0x4a0   : > { %2710 = vpow2.f32 %v2197_v23  ;;  %v2198_v20 = vmul.f32 -1.442695, %v1400_v39 }
 0x4a1   : > { %v1342_v24 = vpop.f32.mrf.mxu0  ;;  %v2417_v2 = vpop.f32.mrf.mxu1 }
 0x4a2   : > { %2712 = vpow2.f32 %v2198_v20 }
 0x4ad   : > { %v2711_v35 = vpop.eup %2710 }
 0x4ae   : > { %v1397_v16 = vadd.f32 1.0, %v2711_v35 }
 0x4af   : > { %v2713_v5 = vpop.eup %2712 }
 0x4b0   : > { %2714 = vrcp.f32 %v1397_v16  ;;  %v1404_v17 = vadd.f32 1.0, %v2713_v5 }
 0x4bd   : > { %v2715_v47 = vpop.eup %2714 }
 0x4be   : > { %v1408_v18 = vmul.f32 %v2715_v47, %v1407_v29 }
 0x4c0   : > { %v1409_v11 = vadd.f32 %v1408_v18, %v3483_v22 }
 0x4c2   : > { %2716 = vtanh.f32 %v1409_v11 }
 0x4c3   : > { %2718 = vrcp.f32 %v1404_v17 }
 0x4cf   : > { %v2717_v62 = vpop.eup %2716 }
 0x4d0   : > { %v1411_v7 = vsub.f32 %v3613_v26, %v2717_v62  ;;  %v2719_v8 = vpop.eup %2718 }
 0x4d2   : > { %v1412_v21 = vmul.f32 %v2719_v8, %v1411_v7 }
 0x4d4   : > { %v3657_v13 = vadd.f32 %v2717_v62, %v1412_v21 }
 0x4d6   : > { %v1414_v14 = vpack.c.bf16 %v3657_v13, %v3657_v13 }
 0x4d8   : > { %1416 = vst [vmem:[#allocation3 + $0xc] sm:$0xf] %v1414_v14  ;;  %1450 = vmatmul.mubr.bf16.vlgmr.msra.gmra.mxu0 %v1414_v14  ;;  %2435 = vmatmul.mubr.bf16.vlgmr.msra.gmra.mxu1 %v1414_v14 }
 0x4d9   : > { %1532 = vmatpush1.bf16.msra.mxu0 %v3317_v30  ;;  %2439 = vmatpush3.bf16.msra.mxu1 %v3342_v38 }
 0x4da   : > { %1533 = vmatprep.subr.bf16.mxu0 %v3321_v31  ;;  %2440 = vmatprep.subr.bf16.mxu1 %v3872_v6 }
 0x4db   : > { %1563 = vmatprep.mubr.bf16.mxu0 %v3873_v9  ;;  %2454 = vmatprep.mubr.msk.bf16.mxu1 %vm3010_vm0, %v3872_v6 }
 0x4dd   : > { %1534 = vmatpush1.bf16.msra.mxu0 %v3326_v33  ;;  %2441 = vmatpush3.bf16.msra.mxu1 %v3356_v43 }
 0x4de   : > { %1535 = vmatprep.subr.bf16.mxu0 %v3331_v34  ;;  %2442 = vmatprep.subr.bf16.mxu1 %v3872_v6 }
 0x4e1   : > { %1536 = vmatpush1.bf16.msra.mxu0 %v3335_v36  ;;  %2443 = vmatpush3.bf16.msra.mxu1 %v3369_v46 }
 0x4e2   : > { %1537 = vmatprep.subr.bf16.mxu0 %v3339_v37  ;;  %2444 = vmatprep.subr.bf16.mxu1 %v3872_v6 }
 0x4e5   : > { %1538 = vmatpush1.bf16.msra.mxu0 %v3347_v40  ;;  %2445 = vmatpush3.bf16.msra.mxu1 %v3383_v50 }
 0x4e6   : > { %1539 = vmatprep.subr.bf16.mxu0 %v3352_v42  ;;  %2446 = vmatprep.subr.bf16.mxu1 %v3872_v6 }
 0x4e9   : > { %1540 = vmatpush1.bf16.msra.mxu0 %v3361_v44  ;;  %2447 = vmatpush3.bf16.msra.mxu1 %v3398_v53 }
 0x4ea   : > { %1541 = vmatprep.subr.bf16.mxu0 %v3365_v45  ;;  %2448 = vmatprep.subr.bf16.mxu1 %v3872_v6 }
 0x4ed   : > { %1542 = vmatpush1.bf16.msra.mxu0 %v3374_v48  ;;  %2449 = vmatpush3.bf16.msra.mxu1 %v3409_v55 }
 0x4ee   : > { %1543 = vmatprep.subr.bf16.mxu0 %v3379_v49  ;;  %2450 = vmatprep.subr.bf16.mxu1 %v3872_v6 }
 0x4f1   : > { %1544 = vmatpush1.bf16.msra.mxu0 %v3390_v51  ;;  %2451 = vmatpush3.bf16.msra.mxu1 %v3416_v56 }
 0x4f2   : > { %1545 = vmatprep.subr.bf16.mxu0 %v3394_v52  ;;  %2452 = vmatprep.subr.bf16.mxu1 %v3872_v6 }
 0x4f5   : > { %1546 = vmatpush1.bf16.msra.mxu0 %v3403_v54  ;;  %2453 = vmatpush3.bf16.msra.mxu1 %v3425_v57 }
 0x4f6   : > { %1645 = vmatprep.subr.bf16.mxu0 %v3313_v28  ;;  %2458 = vmatprep.subr.bf16.mxu1 %v3872_v6 }
 0x598   : > { %v1451_v22 = vpop.f32.mrf.mxu0  ;;  %v1492_v26 = vpop.f32.mrf.mxu1 }
 0x599   : > { %v1507_v60 = vadd.f32 %v3485_v25, %v1451_v22  ;;  %v1521_v20 = vadd.f32 %v3521_v61, %v1492_v26  ;;  %v2762_v22 = vld [vmem:[%s3268_s24 + $0xb0] ss:$12 sps:$4 sm:$0xff]   ;;  %v2763_v26 = vld [vmem:[%s3268_s24 + $0x94] ss:$12 sps:$4 sm:$0xff]  }
 0x59a   : > { %v1453_v15 = vpop.f32.mrf.mxu0  ;;  %v2436_v3 = vpop.f32.mrf.mxu1 }
 0x59b   : > { %v2199_v41 = vmul.f32 -1.442695, %v1507_v60  ;;  %v1514_v4 = vadd.f32 %v3490_v32, %v1453_v15  ;;  %v2764_v60 = vld [vmem:[%s3268_s24 + $0x90] ss:$12 sps:$4 sm:$0xff]   ;;  %v2765_v15 = vld [vmem:[%s3268_s24 + $0x98] ss:$12 sps:$4 sm:$0xff]  }
 0x59c   : > { %v1455_v19 = vpop.f32.mrf.mxu0  ;;  %v1495_v1 = vpop.f32.mrf.mxu1  ;;  %v2766_v3 = vld [vmem:[%s3268_s24 + $0x7c] ss:$12 sps:$4 sm:$0xff]  }
 0x59d   : > { %2720 = vpow2.f32 %v2199_v41  ;;  %v2200_v24 = vmul.f32 -1.442695, %v1514_v4  ;;  %v2767_v41 = vld [vmem:[%s3268_s24 + $0x78] ss:$12 sps:$4 sm:$0xff]   ;;  %v2768_v19 = vld [vmem:[%s3268_s24 + $0x80] ss:$12 sps:$4 sm:$0xff]  }
 0x59e   : > { %v1456_v23 = vpop.f32.mrf.mxu0  ;;  %v2437_v0 = vpop.f32.mrf.mxu1  ;;  %v2770_v1 = vld [vmem:[%s3268_s24 + $0x60] ss:$12 sps:$4 sm:$0xff]  }
 0x59f   : > { %2722 = vpow2.f32 %v2200_v24  ;;  %v2771_v23 = vld [vmem:[%s3268_s24 + $0x4c] ss:$12 sps:$4 sm:$0xff]   ;;  %v2772_v0 = vld [vmem:[%s3268_s24 + $0x48] ss:$12 sps:$4 sm:$0xff]   ;;  %v2774_v24 = vld [vmem:[%s3268_s24 + $0x30] ss:$12 sps:$4 sm:$0xff]  }
 0x5a0   : > { %v2773_v4 = vld [vmem:[%s3268_s24 + $0x34] ss:$12 sps:$4 sm:$0xff]  }
 0x5aa   : > { %v2721_v2 = vpop.eup %2720 }
 0x5ab   : > { %v1511_v39 = vadd.f32 1.0, %v2721_v2  ;;  %v2776_v2 = vld [vmem:[%s3268_s24 + $0x18] ss:$12 sps:$4 sm:$0xff]  }
 0x5ac   : > { %v2723_v28 = vpop.eup %2722 }
 0x5ad   : > { %2724 = vrcp.f32 %v1511_v39  ;;  %v1518_v5 = vadd.f32 1.0, %v2723_v28  ;;  %v2777_v39 = vld [vmem:[%s3268_s24 + $0x4] ss:$12 sps:$4 sm:$0xff]  }
 0x5ba   : > { %v2725_v35 = vpop.eup %2724 }
 0x5bb   : > { %v1522_v25 = vmul.f32 %v2725_v35, %v1521_v20 }
 0x5bd   : > { %v1523_v16 = vadd.f32 %v1522_v25, %v3498_v59 }
 0x5bf   : > { %2726 = vtanh.f32 %v1523_v16 }
 0x5c0   : > { %2728 = vrcp.f32 %v1518_v5 }
 0x5cc   : > { %v2727_v29 = vpop.eup %2726 }
 0x5cd   : > { %v1525_v47 = vsub.f32 %v3657_v13, %v2727_v29  ;;  %v2729_v18 = vpop.eup %2728 }
 0x5cf   : > { %v1526_v32 = vmul.f32 %v2729_v18, %v1525_v47  ;;  %v3874_v18 = vld [vmem:[#allocation22_spill] sm:$0xff] }
 0x5d1   : > { %v3701_v11 = vadd.f32 %v2727_v29, %v1526_v32 }
 0x5d3   : > { %v1528_v17 = vpack.c.bf16 %v3701_v11, %v3701_v11 }
 0x5d5   : > { %1530 = vst [vmem:[#allocation3 + $0x10] sm:$0xf] %v1528_v17  ;;  %1564 = vmatmul.mubr.bf16.vlgmr.msra.gmra.mxu0 %v1528_v17  ;;  %2455 = vmatmul.mubr.bf16.vlgmr.msra.gmra.mxu1 %v1528_v17 }
 0x5d6   : > { %1646 = vmatpush1.bf16.msra.mxu0 %v3317_v30  ;;  %2459 = vmatpush3.bf16.msra.mxu1 %v3342_v38  ;;  %v2760_v30 = vld [vmem:[%s3268_s24 + $0xac] ss:$12 sps:$4 sm:$0xff]  }
 0x5d7   : > { %1647 = vmatprep.subr.bf16.mxu0 %v3321_v31  ;;  %2460 = vmatprep.subr.bf16.mxu1 %v3872_v6 }
 0x5d8   : > { %1677 = vmatprep.mubr.bf16.mxu0 %v3873_v9  ;;  %2474 = vmatprep.mubr.msk.bf16.mxu1 %vm3010_vm0, %v3872_v6 }
 0x5da   : > { %1648 = vmatpush1.bf16.msra.mxu0 %v3326_v33  ;;  %2461 = vmatpush3.bf16.msra.mxu1 %v3356_v43 }
 0x5db   : > { %1649 = vmatprep.subr.bf16.mxu0 %v3331_v34  ;;  %2462 = vmatprep.subr.bf16.mxu1 %v3872_v6 }
 0x5de   : > { %1650 = vmatpush1.bf16.msra.mxu0 %v3335_v36  ;;  %2463 = vmatpush3.bf16.msra.mxu1 %v3369_v46 }
 0x5df   : > { %1651 = vmatprep.subr.bf16.mxu0 %v3339_v37  ;;  %2464 = vmatprep.subr.bf16.mxu1 %v3872_v6 }
 0x5e2   : > { %1652 = vmatpush1.bf16.msra.mxu0 %v3347_v40  ;;  %2465 = vmatpush3.bf16.msra.mxu1 %v3383_v50 }
 0x5e3   : > { %1653 = vmatprep.subr.bf16.mxu0 %v3352_v42  ;;  %2466 = vmatprep.subr.bf16.mxu1 %v3872_v6 }
 0x5e6   : > { %1654 = vmatpush1.bf16.msra.mxu0 %v3361_v44  ;;  %2467 = vmatpush3.bf16.msra.mxu1 %v3398_v53 }
 0x5e7   : > { %1655 = vmatprep.subr.bf16.mxu0 %v3365_v45  ;;  %2468 = vmatprep.subr.bf16.mxu1 %v3872_v6 }
 0x5ea   : > { %1656 = vmatpush1.bf16.msra.mxu0 %v3374_v48  ;;  %2469 = vmatpush3.bf16.msra.mxu1 %v3409_v55 }
 0x5eb   : > { %1657 = vmatprep.subr.bf16.mxu0 %v3379_v49  ;;  %2470 = vmatprep.subr.bf16.mxu1 %v3872_v6 }
 0x5ee   : > { %1658 = vmatpush1.bf16.msra.mxu0 %v3390_v51  ;;  %2471 = vmatpush3.bf16.msra.mxu1 %v3416_v56 }
 0x5ef   : > { %1659 = vmatprep.subr.bf16.mxu0 %v3394_v52  ;;  %2472 = vmatprep.subr.bf16.mxu1 %v3872_v6 }
 0x5f2   : > { %1660 = vmatpush1.bf16.msra.mxu0 %v3403_v54  ;;  %2473 = vmatpush3.bf16.msra.mxu1 %v3425_v57 }
 0x5f3   : > { %1759 = vmatprep.subr.bf16.mxu0 %v2760_v30  ;;  %2478 = vmatprep.subr.bf16.mxu1 %v3872_v6 }
 0x695   : > { %v1565_v31 = vpop.f32.mrf.mxu0  ;;  %v1606_v33 = vpop.f32.mrf.mxu1 }
 0x696   : > { %v1621_v34 = vadd.f32 %v3495_v58, %v1565_v31  ;;  %v1635_v52 = vadd.f32 %v3521_v61, %v1606_v33  ;;  %v3875_v33 = vld [vmem:[#allocation20_spill] sm:$0xff] }
 0x697   : > { %v1567_v36 = vpop.f32.mrf.mxu0  ;;  %v2456_v37 = vpop.f32.mrf.mxu1 }
 0x698   : > { %v2201_v38 = vmul.f32 -1.442695, %v1621_v34  ;;  %v1628_v45 = vadd.f32 %v3500_v63, %v1567_v36 }
 0x699   : > { %v1569_v40 = vpop.f32.mrf.mxu0  ;;  %v1609_v42 = vpop.f32.mrf.mxu1 }
 0x69a   : > { %2730 = vpow2.f32 %v2201_v38  ;;  %v2202_v46 = vmul.f32 -1.442695, %v1628_v45 }
 0x69b   : > { %v1570_v43 = vpop.f32.mrf.mxu0  ;;  %v2457_v44 = vpop.f32.mrf.mxu1 }
 0x69c   : > { %2732 = vpow2.f32 %v2202_v46 }
 0x6a7   : > { %v2731_v48 = vpop.eup %2730 }
 0x6a8   : > { %v1625_v49 = vadd.f32 1.0, %v2731_v48  ;;  %v3876_v48 = vld [vmem:[#allocation23_spill] sm:$0xff] }
 0x6a9   : > { %v2733_v51 = vpop.eup %2732 }
 0x6aa   : > { %2734 = vrcp.f32 %v1625_v49  ;;  %v1632_v62 = vadd.f32 1.0, %v2733_v51 }
 0x6b7   : > { %v2735_v54 = vpop.eup %2734 }
 0x6b8   : > { %v1636_v58 = vmul.f32 %v2735_v54, %v1635_v52 }
 0x6ba   : > { %v1637_v59 = vadd.f32 %v1636_v58, %v3508_v12  ;;  %v2761_v12 = vld [vmem:[%s3268_s24 + $0xa8] ss:$12 sps:$4 sm:$0xff]  }
 0x6bc   : > { %2736 = vtanh.f32 %v1637_v59 }
 0x6bd   : > { %2738 = vrcp.f32 %v1632_v62 }
 0x6c9   : > { %v2737_v7 = vpop.eup %2736 }
 0x6ca   : > { %v1639_v63 = vsub.f32 %v3701_v11, %v2737_v7  ;;  %v2739_v8 = vpop.eup %2738 }
 0x6cc   : > { %v1640_v21 = vmul.f32 %v2739_v8, %v1639_v63 }
 0x6ce   : > { %v3745_v13 = vadd.f32 %v2737_v7, %v1640_v21 }
 0x6d0   : > { %v1642_v14 = vpack.c.bf16 %v3745_v13, %v3745_v13 }
 0x6d2   : > { %1644 = vst [vmem:[#allocation3 + $0x14] sm:$0xf] %v1642_v14  ;;  %1678 = vmatmul.mubr.bf16.vlgmr.msra.gmra.mxu0 %v1642_v14  ;;  %2475 = vmatmul.mubr.bf16.vlgmr.msra.gmra.mxu1 %v1642_v14 }
 0x6d3   : > { %1760 = vmatpush1.bf16.msra.mxu0 %v2761_v12  ;;  %2479 = vmatpush3.bf16.msra.mxu1 %v2762_v22 }
 0x6d4   : > { %1761 = vmatprep.subr.bf16.mxu0 %v2763_v26  ;;  %2480 = vmatprep.subr.bf16.mxu1 %v3872_v6 }
 0x6d5   : > { %1791 = vmatprep.mubr.bf16.mxu0 %v3873_v9  ;;  %2494 = vmatprep.mubr.msk.bf16.mxu1 %vm3010_vm0, %v3872_v6  ;;  %v2769_v9 = vld [vmem:[%s3268_s24 + $0x64] ss:$12 sps:$4 sm:$0xff]  }
 0x6d7   : > { %1762 = vmatpush1.bf16.msra.mxu0 %v2764_v60  ;;  %2481 = vmatpush3.bf16.msra.mxu1 %v2765_v15  ;;  %v3877_v60 = vld [vmem:[#allocation21_spill] sm:$0xff] }
 0x6d8   : > { %1763 = vmatprep.subr.bf16.mxu0 %v2766_v3  ;;  %2482 = vmatprep.subr.bf16.mxu1 %v3872_v6 }
 0x6db   : > { %1764 = vmatpush1.bf16.msra.mxu0 %v2767_v41  ;;  %2483 = vmatpush3.bf16.msra.mxu1 %v2768_v19 }
 0x6dc   : > { %1765 = vmatprep.subr.bf16.mxu0 %v2769_v9  ;;  %2484 = vmatprep.subr.bf16.mxu1 %v3872_v6 }
 0x6df   : > { %1766 = vmatpush1.bf16.msra.mxu0 %v2770_v1  ;;  %2485 = vmatpush3.bf16.msra.mxu1 %v3383_v50  ;;  %v2775_v50 = vld [vmem:[%s3268_s24 + $0x1c] ss:$12 sps:$4 sm:$0xff]  }
 0x6e0   : > { %1767 = vmatprep.subr.bf16.mxu0 %v2771_v23  ;;  %2486 = vmatprep.subr.bf16.mxu1 %v3872_v6 }
 0x6e3   : > { %1768 = vmatpush1.bf16.msra.mxu0 %v2772_v0  ;;  %2487 = vmatpush3.bf16.msra.mxu1 %v3398_v53  ;;  %v2778_v53 = vld [vmem:[%s3268_s24] ss:$12 sps:$4 sm:$0xff]  }
 0x6e4   : > { %1769 = vmatprep.subr.bf16.mxu0 %v2773_v4  ;;  %2488 = vmatprep.subr.bf16.mxu1 %v3872_v6 }
 0x6e7   : > { %1770 = vmatpush1.bf16.msra.mxu0 %v2774_v24  ;;  %2489 = vmatpush3.bf16.msra.mxu1 %v3409_v55 }
 0x6e8   : > { %1771 = vmatprep.subr.bf16.mxu0 %v2775_v50  ;;  %2490 = vmatprep.subr.bf16.mxu1 %v3872_v6 }
 0x6eb   : > { %1772 = vmatpush1.bf16.msra.mxu0 %v2776_v2  ;;  %2491 = vmatpush3.bf16.msra.mxu1 %v3416_v56 }
 0x6ec   : > { %1773 = vmatprep.subr.bf16.mxu0 %v2777_v39  ;;  %2492 = vmatprep.subr.bf16.mxu1 %v3872_v6 }
 0x6ef   : > { %1774 = vmatpush1.bf16.msra.mxu0 %v2778_v53  ;;  %2493 = vmatpush3.bf16.msra.mxu1 %v3425_v57 }
 0x792   : > { %v1679_v28 = vpop.f32.mrf.mxu0  ;;  %v1720_v20 = vpop.f32.mrf.mxu1 }
 0x793   : > { %v1735_v55 = vadd.f32 %v3505_v10, %v1679_v28  ;;  %v1749_v30 = vadd.f32 %v3521_v61, %v1720_v20 }
 0x794   : > { %v1681_v35 = vpop.f32.mrf.mxu0  ;;  %v2476_v25 = vpop.f32.mrf.mxu1 }
 0x795   : > { %v2203_v16 = vmul.f32 -1.442695, %v1735_v55  ;;  %v1742_v32 = vadd.f32 %v3874_v18, %v1681_v35 }
 0x796   : > { %v1683_v5 = vpop.f32.mrf.mxu0  ;;  %v1723_v29 = vpop.f32.mrf.mxu1 }
 0x797   : > { %2740 = vpow2.f32 %v2203_v16  ;;  %v2204_v11 = vmul.f32 -1.442695, %v1742_v32 }
 0x798   : > { %v1684_v47 = vpop.f32.mrf.mxu0  ;;  %v2477_v56 = vpop.f32.mrf.mxu1 }
 0x799   : > { %2742 = vpow2.f32 %v2204_v11 }
 0x7a4   : > { %v2741_v6 = vpop.eup %2740 }
 0x7a5   : > { %v1739_v17 = vadd.f32 1.0, %v2741_v6 }
 0x7a6   : > { %v2743_v57 = vpop.eup %2742 }
 0x7a7   : > { %2744 = vrcp.f32 %v1739_v17  ;;  %v1746_v36 = vadd.f32 1.0, %v2743_v57 }
 0x7b4   : > { %v2745_v31 = vpop.eup %2744 }
 0x7b5   : > { %v1750_v10 = vmul.f32 %v2745_v31, %v1749_v30 }
 0x7b7   : > { %v1751_v34 = vadd.f32 %v1750_v10, %v3875_v33 }
 0x7b9   : > { %2746 = vtanh.f32 %v1751_v34 }
 0x7ba   : > { %2748 = vrcp.f32 %v1746_v36 }
 0x7c6   : > { %v2747_v37 = vpop.eup %2746 }
 0x7c7   : > { %v1753_v38 = vsub.f32 %v3745_v13, %v2747_v37  ;;  %v2749_v40 = vpop.eup %2748 }
 0x7c9   : > { %v1754_v42 = vmul.f32 %v2749_v40, %v1753_v38 }
 0x7cb   : > { %v1755_v43 = vadd.f32 %v2747_v37, %v1754_v42 }
 0x7cd   : > { %v1756_v44 = vpack.c.bf16 %v1755_v43, %v1755_v43 }
 0x7cf   : > { %1758 = vst [vmem:[#allocation3 + $0x18] sm:$0xf] %v1756_v44  ;;  %1792 = vmatmul.mubr.bf16.vlgmr.msra.gmra.mxu0 %v1756_v44  ;;  %2495 = vmatmul.mubr.bf16.vlgmr.msra.gmra.mxu1 %v1756_v44 }
 0x88f   : > { %v1793_v45 = vpop.f32.mrf.mxu0  ;;  %v1834_v46 = vpop.f32.mrf.mxu1 }
 0x890   : > { %v1849_v49 = vadd.f32 %v3876_v48, %v1793_v45  ;;  %v1863_v12 = vadd.f32 %v3521_v61, %v1834_v46 }
 0x891   : > { %v1795_v51 = vpop.f32.mrf.mxu0  ;;  %v2496_v52 = vpop.f32.mrf.mxu1 }
 0x892   : > { %v2205_v54 = vmul.f32 -1.442695, %v1849_v49  ;;  %v1856_v63 = vadd.f32 %v3514_v27, %v1795_v51 }
 0x893   : > { %v1797_v58 = vpop.f32.mrf.mxu0  ;;  %v1837_v59 = vpop.f32.mrf.mxu1 }
 0x894   : > { %2750 = vpow2.f32 %v2205_v54  ;;  %v2206_v8 = vmul.f32 -1.442695, %v1856_v63 }
 0x895   : > { %v1798_v62 = vpop.f32.mrf.mxu0  ;;  %v2497_v7 = vpop.f32.mrf.mxu1 }
 0x896   : > { %2752 = vpow2.f32 %v2206_v8 }
 0x8a1   : > { %v2751_v21 = vpop.eup %2750 }
 0x8a2   : > { %v1853_v13 = vadd.f32 1.0, %v2751_v21 }
 0x8a3   : > { %v2753_v14 = vpop.eup %2752 }
 0x8a4   : > { %2754 = vrcp.f32 %v1853_v13  ;;  %v1860_v3 = vadd.f32 1.0, %v2753_v14 }
 0x8b1   : > { %v2755_v22 = vpop.eup %2754 }
 0x8b2   : > { %v1864_v26 = vmul.f32 %v2755_v22, %v1863_v12 }
 0x8b4   : > { %v1865_v15 = vadd.f32 %v1864_v26, %v3877_v60 }
 0x8b6   : > { %2756 = vtanh.f32 %v1865_v15 }
 0x8b7   : > { %2758 = vrcp.f32 %v1860_v3 }
 0x8c3   : > { %v2757_v41 = vpop.eup %2756 }
 0x8c4   : > { %v1867_v19 = vsub.f32 %v1755_v43, %v2757_v41  ;;  %v2759_v9 = vpop.eup %2758 }
 0x8c6   : > { %v1868_v1 = vmul.f32 %v2759_v9, %v1867_v19 }
 0x8c8   : > { %v1869_v27 = vadd.f32 %v2757_v41, %v1868_v1  ;;  %1876 = sbr.rel (%p2207_p6) target bundleno = 2485 (0x9b5), region = 76 }
 0x8ca   : > { %v1870_v23 = vpack.c.bf16 %v1869_v27, %v1869_v27 }
 0x8cc   : > { %1872 = vst [vmem:[#allocation3 + $0x1c] sm:$0xf] %v1870_v23 }
 0x8cd   : > { %v2779_v0 = vld [vmem:[#allocation12 + $0x38] sm:$0xff]   ;;  %v3011_v4 = vmov 0.0   ;;  %v2780_v61 = vld [vmem:[#allocation12 + $0x30] sm:$0xff]   ;;  %vm3012_vm1 = vmmov 0   ;;  %v2781_v24 = vld [vmem:[#allocation12 + $0x28] sm:$0xff]  }
 0x8ce   : > { %2498 = vmatprep.subr.bf16.mxu0 %v3011_v4  ;;  %2514 = vmatprep.mubr.msk.bf16.mxu0 %vm3012_vm1, %v3011_v4  ;;  %v2782_v50 = vld [vmem:[#allocation12 + $0x20] sm:$0xff]   ;;  %v2783_v2 = vld [vmem:[#allocation12 + $0x18] sm:$0xff]   ;;  %v2784_v39 = vld [vmem:[#allocation12 + $0x10] sm:$0xff]  }
 0x8cf   : > { %2499 = vmatpush3.bf16.msra.mxu0 %v2779_v0  ;;  %v2785_v53 = vld [vmem:[#allocation12 + $0x8] sm:$0xff]   ;;  %v2786_v28 = vld [vmem:[#allocation12] sm:$0xff]   ;;  %v2208_v20 = vld [vmem:[%s3826_s6] ss:$0 sm:$0xff] }
 0x8d0   : > { %2500 = vmatprep.subr.bf16.mxu0 %v3011_v4 }
 0x8d3   : > { %2501 = vmatpush3.bf16.msra.mxu0 %v2780_v61 }
 0x8d4   : > { %2502 = vmatprep.subr.bf16.mxu0 %v3011_v4 }
 0x8d7   : > { %2503 = vmatpush3.bf16.msra.mxu0 %v2781_v24 }
 0x8d8   : > { %2504 = vmatprep.subr.bf16.mxu0 %v3011_v4 }
 0x8db   : > { %2505 = vmatpush3.bf16.msra.mxu0 %v2782_v50 }
 0x8dc   : > { %2506 = vmatprep.subr.bf16.mxu0 %v3011_v4 }
 0x8df   : > { %2507 = vmatpush3.bf16.msra.mxu0 %v2783_v2 }
 0x8e0   : > { %2508 = vmatprep.subr.bf16.mxu0 %v3011_v4 }
 0x8e3   : > { %2509 = vmatpush3.bf16.msra.mxu0 %v2784_v39 }
 0x8e4   : > { %2510 = vmatprep.subr.bf16.mxu0 %v3011_v4 }
 0x8e7   : > { %2511 = vmatpush3.bf16.msra.mxu0 %v2785_v53 }
 0x8e8   : > { %2512 = vmatprep.subr.bf16.mxu0 %v3011_v4 }
 0x8eb   : > { %2513 = vmatpush3.bf16.msra.mxu0 %v2786_v28 }
 0x8ee   : > { %2515 = vmatmul.mubr.bf16.vlgmr.msra.gmra.mxu0 %v1870_v23 }
 0x9ae   : > { %v1982_v55 = vpop.f32.mrf.mxu0 }
 0x9af   : > { %v1983_v35 = vadd.f32 %v2208_v20, %v1982_v55 }
 0x9b0   : > { %v2516_v25 = vpop.f32.mrf.mxu0 }
 0x9b1   : > { %1988 = vst [vmem:[#allocation13] sm:$0xff] %v1983_v35 }
 0x9b2   : > { %v1985_v16 = vpop.f32.mrf.mxu0 }
 0x9b4   : > { %v2517_v5 = vpop.f32.mrf.mxu0 }
 0x9b5 PF: > { %p2566_p7 = scmp.eq.s32.totalorder %s3073_s28, 1  ;;  %s3013_s16 = smov [#allocation13]  }
 0x9b6   : > { %s1996_s27 = sshll.u32 %s3013_s16, 4  ;;  %s1997_s27 = int_to_ptr.vmem [resolvable:$true] %s1996_s27 }
 0x9b7   : > { %s2923_s1 = scalar_lea.vmem %s1997_s27, 128  ;;  %p2930_p5 = scmp.lt.s32.totalorder %s1997_s27, %s1997_s27 }
 0x9b8   : > { %p2924_p11 = scmp.ne.s32.totalorder %s1997_s27, %s2923_s1  ;;  %p2931_p10 = scmp.lt.s32.totalorder %s2923_s1, %s2923_s1 }
 0x9ba   : > { %p2925_p4 = pnand %p2924_p11, %p2566_p7  ;;  %p2932_p12 = por %p2931_p10, %p2930_p5 }
 0x9bc   : > { %p2926_p1 = pneg %p2925_p4 }
 0x9be   : > { %p2933_p13 = pnand %p2932_p12, %p2926_p1 }
 0x9c0   : > { %2936 = shalt.err (!%p2933_p13)
}
 0x9c1   : > { %2541 = dma.vmem_to_hbm [thread:$0]  (%p2566_p7), %s1997_s27, 128, %s3827_s7, [#allocation6]  }
 0x9c2   : > { %2980 = dma.done.wait (%p2566_p7), [#allocation6], 128  }
 0x9c3   : > { %2982 = vsyncadd (%p2566_p7), [#allocation6], 4294967168 }
 0x9c4 PF: > { %s3878_s23 = sld [smem:[#allocation19_spill]]  ;;  %p22_p0 = scmp.ge.s32.totalorder %s3076_s29, 4  }
 0x9c5   : > { %s3879_s24 = smov %s2989_s25  ;;  %s3880_s25 = smov %s2993_s26 }
 0x9c6   : > { %s3882_s27 = smov %s3076_s29  ;;  %24 = sbr.rel (!%p22_p0) target bundleno = 10 (0xa), region = 144 }
 0x9ca   : > { %s3881_s26 = smov %s3878_s23 }
 0x9cb   :  { %2009 = vsyncpa [#allocation5], 1 }
 0x9cc   :  { %2011 = vsyncpa [#allocation5 + $0x1], 1 }
 0x9cd   :  { %2012 = vsyncpa [#allocation8], 1 }
 0x9ce   :  { %2014 = vsyncpa [#allocation8 + $0x1], 1 }
 0x9cf   :  { %2015 = vsyncpa [#allocation11], 1 }
 0x9d0   :  { %2017 = vsyncpa [#allocation11 + $0x1], 1 }
 0x9d1   :  { %2018 = vsyncpa [#allocation6], 1 }
 0x9d2   :  { %2020 = vsyncpa [#allocation6 + $0x1], 1 }

</bundles_post_ra>
